<compile_context>
chip_gen: v5e
topology: v5e:2x2
jax: 0.10.0
libtpu: 0.0.40
codegen_flags: <defaults>
</compile_context>

<pallas_src>
import functools

import jax
import jax.numpy as jnp
from jax.experimental import pallas as pl
from jax.experimental.pallas import tpu as pltpu

NHEAD = 8
LN_EPS = 1e-5
F32 = jnp.float32


def _layernorm(x, w, b):
    mu = jnp.mean(x, axis=-1, keepdims=True)
    var = jnp.mean((x - mu) ** 2, axis=-1, keepdims=True)
    return (x - mu) * jax.lax.rsqrt(var + LN_EPS) * w + b


def meltr_kernel(
        x_ref,                                  # (B*S, I)
        w_fc1_ref, b_fc1_ref,                   # (I, H1), (1, H1)
        w_fc2_ref, b_fc2_ref,                   # (H1, E), (1, E)
        task_ref,                               # (B*S, E)  (task weight tiled over batch)
        wq_ref, bq_ref,                         # (G, E, dh), (G, 1, dh)   G = B*NHEAD
        wk_ref, bk_ref,
        wv_ref, bv_ref,
        wo_ref, bo_ref,                         # (G, dh, E), (1, E)
        ln1_w_ref, ln1_b_ref,                   # (1, E)
        w_lin1_ref, b_lin1_ref,                 # (E, F), (1, F)
        w_lin2_ref, b_lin2_ref,                 # (F, E), (1, E)
        ln2_w_ref, ln2_b_ref,                   # (1, E)
        pool_ref,                               # (B, B*S) mean-over-S matrix
        w_out_ref,                              # (E, O)
        out_ref,                                # (B, O)
        *, B, S):
    x2 = x_ref[...]                             # whole batch, one row slab

    # scale_embedding = loss_fc2(relu(loss_fc1(x)))
    h = jnp.maximum(
        jnp.dot(x2, w_fc1_ref[...], preferred_element_type=F32) + b_fc1_ref[...], 0.0)
    se = jnp.dot(h, w_fc2_ref[...], preferred_element_type=F32) + b_fc2_ref[...]

    # input = scale_embedding + task_embedding.weight (task pre-tiled over B)
    src = se + task_ref[...]                    # (B*S, E)
    E = src.shape[-1]
    G = B * NHEAD

    # --- TransformerEncoderLayer: multi-head self-attention ------------------
    # Replicate each batch's rows across heads:  g = b*NHEAD + n  ->  src[b].
    # All leading-dim reshapes/broadcasts keep the tiled (S, E) trailing dims
    # intact (S is a multiple of the 8-sublane tile here), so no relayouts.
    src_g = jnp.broadcast_to(src.reshape(B, 1, S, E),
                             (B, NHEAD, S, E)).reshape(G, S, E)

    # q-scale (1/sqrt(dh)) is folded into wq/bq host-side.
    q = jnp.einsum('gse,ged->gsd', src_g, wq_ref[...],
                   preferred_element_type=F32) + bq_ref[...]
    k = jnp.einsum('gse,ged->gsd', src_g, wk_ref[...],
                   preferred_element_type=F32) + bk_ref[...]
    v = jnp.einsum('gse,ged->gsd', src_g, wv_ref[...],
                   preferred_element_type=F32) + bv_ref[...]

    s = jnp.einsum('gqd,gkd->gqk', q, k, preferred_element_type=F32)   # (G,S,S)
    s = s - jnp.max(s, axis=-1, keepdims=True)
    p = jnp.exp(s)
    # exact divide kept: softmax cost is negligible at these shapes and it
    # preserves f32 accuracy vs. approx reciprocal.
    p = p / jnp.sum(p, axis=-1, keepdims=True)
    ctx = jnp.einsum('gqk,gkd->gqd', p, v, preferred_element_type=F32)  # (G,S,dh)

    proj = jnp.einsum('gsd,gde->gse', ctx, wo_ref[...],
                      preferred_element_type=F32)                       # (G,S,E)

    # head-sum == concat(heads) @ W_out  (static unrolled add over leading dim)
    proj4 = proj.reshape(B, NHEAD, S, E)
    attn3 = proj4[:, 0]
    for n in range(1, NHEAD):
        attn3 = attn3 + proj4[:, n]
    attn = attn3.reshape(B * S, E) + bo_ref[...]                        # (B*S, E)

    # residual + LayerNorm1 (dropout = identity, eval semantics)
    src = _layernorm(src + attn, ln1_w_ref[...], ln1_b_ref[...])

    # feed-forward (ReLU, dim_feedforward = f_dim)
    ff = jnp.maximum(
        jnp.dot(src, w_lin1_ref[...], preferred_element_type=F32) + b_lin1_ref[...], 0.0)
    ff = jnp.dot(ff, w_lin2_ref[...], preferred_element_type=F32) + b_lin2_ref[...]

    # residual + LayerNorm2
    src = _layernorm(src + ff, ln2_w_ref[...], ln2_b_ref[...])

    # mean over the sequence axis (as a tiny matmul), then fc1 (no bias)
    pooled = jnp.dot(pool_ref[...], src, preferred_element_type=F32)    # (B, E)
    out_ref[...] = jnp.dot(pooled, w_out_ref[...], preferred_element_type=F32)


def meltr_forward(x, params):
    """x: (B, S, I) float32.  params: PyTorch-convention weights (see make_params)."""
    B, S, I = x.shape
    E = params["task"].shape[1]
    dh = E // NHEAD
    O = params["w_out"].shape[0]
    scale = 1.0 / float(dh) ** 0.5

    # ---- host-side preprocessing: pre-transpose / split / head-stack / tile ----
    w_in = params["w_inproj"]                   # (3E, E) PyTorch (out, in)
    b_in = params["b_inproj"].reshape(-1)       # (3E,)

    def head_stack_w(w, s=1.0):
        # (E_out, E_in) PyTorch layout -> (NHEAD, E_in, dh): x @ W_h gives (S, dh)
        return (w.T * s).reshape(E, NHEAD, dh).transpose(1, 0, 2)

    def head_stack_b(bias, s=1.0):
        return (bias * s).reshape(NHEAD, 1, dh)

    def tile_b(a):                              # (NHEAD, ...) -> (B*NHEAD, ...)
        return jnp.tile(a, (B,) + (1,) * (a.ndim - 1))

    wq_g = tile_b(head_stack_w(w_in[:E], scale))       # 1/sqrt(dh) folded into Wq, bq
    wk_g = tile_b(head_stack_w(w_in[E:2 * E]))
    wv_g = tile_b(head_stack_w(w_in[2 * E:]))
    bq_g = tile_b(head_stack_b(b_in[:E], scale))
    bk_g = tile_b(head_stack_b(b_in[E:2 * E]))
    bv_g = tile_b(head_stack_b(b_in[2 * E:]))
    wo_g = tile_b(params["w_outproj"].T.reshape(NHEAD, dh, E))

    task2 = jnp.tile(params["task"], (B, 1))    # (B*S, E)
    pool = jnp.kron(jnp.eye(B, dtype=F32), jnp.full((1, S), 1.0 / S, F32))  # (B, B*S)

    plist = [
        params["w_fc1"].T, params["b_fc1"].reshape(1, -1),
        params["w_fc2"].T, params["b_fc2"].reshape(1, -1),
        task2,
        wq_g, bq_g, wk_g, bk_g, wv_g, bv_g,
        wo_g, params["b_outproj"].reshape(1, -1),
        params["ln1_w"].reshape(1, -1), params["ln1_b"].reshape(1, -1),
        params["w_lin1"].T, params["b_lin1"].reshape(1, -1),
        params["w_lin2"].T, params["b_lin2"].reshape(1, -1),
        params["ln2_w"].reshape(1, -1), params["ln2_b"].reshape(1, -1),
        pool,
        params["w_out"].T,
    ]

    x2 = x.reshape(B * S, I)

    def full_spec(a):
        nd = a.ndim
        return pl.BlockSpec(a.shape, lambda i, _nd=nd: (0,) * _nd)

    out = pl.pallas_call(
        functools.partial(meltr_kernel, B=B, S=S),
        out_shape=jax.ShapeDtypeStruct((B, O), F32),
        grid=(1,),                              # single step: whole batch at once
        in_specs=[full_spec(x2)] + [full_spec(p) for p in plist],
        out_specs=pl.BlockSpec((B, O), lambda i: (0, 0)),
        # Single-step grid: nothing to shard.  For large B, re-block the batch
        # into a grid axis and mark it "parallel" so v7x's two TCs split it.
        compiler_params=pltpu.CompilerParams(dimension_semantics=("arbitrary",)),
    )(x2, *plist)
    return out


def meltr_ref(x, p):
    """Pure-JAX reference replicating the PyTorch forward (eval-mode dropout)."""
    def ln(v, w, b):
        mu = v.mean(-1, keepdims=True)
        var = ((v - mu) ** 2).mean(-1, keepdims=True)
        return (v - mu) / jnp.sqrt(var + LN_EPS) * w[0] + b[0]

    h = jax.nn.relu(x @ p["w_fc1"].T + p["b_fc1"][0])
    se = h @ p["w_fc2"].T + p["b_fc2"][0]
    src = se + p["task"]
    B, S, E = src.shape
    dh = E // NHEAD
    qkv = src @ p["w_inproj"].T + p["b_inproj"][0]
    q, k, v = qkv[..., :E], qkv[..., E:2 * E], qkv[..., 2 * E:]
    qh = q.reshape(B, S, NHEAD, dh).transpose(0, 2, 1, 3) / jnp.sqrt(float(dh))
    kh = k.reshape(B, S, NHEAD, dh).transpose(0, 2, 1, 3)
    vh = v.reshape(B, S, NHEAD, dh).transpose(0, 2, 1, 3)
    sc = qh @ kh.transpose(0, 1, 3, 2)
    pw = jax.nn.softmax(sc, axis=-1)
    o = (pw @ vh).transpose(0, 2, 1, 3).reshape(B, S, E)
    attn = o @ p["w_outproj"].T + p["b_outproj"][0]
    src = ln(src + attn, p["ln1_w"], p["ln1_b"])
    ff = jax.nn.relu(src @ p["w_lin1"].T + p["b_lin1"][0])
    ff = ff @ p["w_lin2"].T + p["b_lin2"][0]
    src = ln(src + ff, p["ln2_w"], p["ln2_b"])
    return src.mean(1) @ p["w_out"].T


def make_params(key, t_dim, f_dim, i_dim, h1_dim, h2_dim, o_dim):
    ks = jax.random.split(key, 12)
    s = 0.1
    params = {
        "w_fc1": jax.random.normal(ks[0], (h1_dim, i_dim), F32) * s,
        "b_fc1": (jax.random.normal(ks[1], (h1_dim,), F32) * s).reshape(1, -1),
        "w_fc2": jax.random.normal(ks[2], (h2_dim, h1_dim), F32) * s,
        "b_fc2": (jax.random.normal(ks[3], (h2_dim,), F32) * s).reshape(1, -1),
        "task": jax.random.normal(ks[4], (t_dim, h2_dim), F32) * s,
        "w_inproj": jax.random.normal(ks[5], (3 * h2_dim, h2_dim), F32) * s,
        "b_inproj": (jax.random.normal(ks[6], (3 * h2_dim,), F32) * s).reshape(1, -1),
        "w_outproj": jax.random.normal(ks[7], (h2_dim, h2_dim), F32) * s,
        "b_outproj": jnp.zeros((1, h2_dim), F32),
        "ln1_w": jnp.ones((1, h2_dim), F32),
        "ln1_b": jnp.zeros((1, h2_dim), F32),
        "w_lin1": jax.random.normal(ks[8], (f_dim, h2_dim), F32) * s,
        "b_lin1": (jax.random.normal(ks[9], (f_dim,), F32) * s).reshape(1, -1),
        "w_lin2": jax.random.normal(ks[10], (h2_dim, f_dim), F32) * s,
        "b_lin2": jnp.zeros((1, h2_dim), F32),
        "ln2_w": jnp.ones((1, h2_dim), F32),
        "ln2_b": jnp.zeros((1, h2_dim), F32),
        "w_out": jax.random.normal(ks[11], (o_dim, h2_dim), F32) * s,
    }
    return params


if __name__ == "__main__":
    # MELTR(t_dim=8, f_dim=64, i_dim=4, h1_dim=32, h2_dim=32, o_dim=4), batch=2
    B, t_dim, f_dim, i_dim, h1_dim, h2_dim, o_dim = 2, 8, 64, 4, 32, 32, 4

    key = jax.random.PRNGKey(0)
    kx, kp = jax.random.split(key)
    x = jax.random.normal(kx, (B, t_dim, i_dim), F32)
    params = make_params(kp, t_dim, f_dim, i_dim, h1_dim, h2_dim, o_dim)

    out = meltr_forward(x, params)
    out = jax.block_until_ready(out)

    ref = meltr_ref(x, params)
    assert out.shape == (B, o_dim)
    assert jnp.allclose(out, ref, atol=1e-4, rtol=1e-4), (out, ref)

    print("KERNEL_OK")
</pallas_src>

<mosaic_0001>
module attributes {stable_mosaic.version = 11 : i64} {
  func.func @meltr_kernel(%arg0: i32, %arg1: memref<16x4xf32, #tpu.memory_space<vmem>>, %arg2: memref<4x32xf32, #tpu.memory_space<vmem>>, %arg3: memref<1x32xf32, #tpu.memory_space<vmem>>, %arg4: memref<32x32xf32, #tpu.memory_space<vmem>>, %arg5: memref<1x32xf32, #tpu.memory_space<vmem>>, %arg6: memref<16x32xf32, #tpu.memory_space<vmem>>, %arg7: memref<16x32x4xf32, #tpu.memory_space<vmem>>, %arg8: memref<16x1x4xf32, #tpu.memory_space<vmem>>, %arg9: memref<16x32x4xf32, #tpu.memory_space<vmem>>, %arg10: memref<16x1x4xf32, #tpu.memory_space<vmem>>, %arg11: memref<16x32x4xf32, #tpu.memory_space<vmem>>, %arg12: memref<16x1x4xf32, #tpu.memory_space<vmem>>, %arg13: memref<16x4x32xf32, #tpu.memory_space<vmem>>, %arg14: memref<1x32xf32, #tpu.memory_space<vmem>>, %arg15: memref<1x32xf32, #tpu.memory_space<vmem>>, %arg16: memref<1x32xf32, #tpu.memory_space<vmem>>, %arg17: memref<32x64xf32, #tpu.memory_space<vmem>>, %arg18: memref<1x64xf32, #tpu.memory_space<vmem>>, %arg19: memref<64x32xf32, #tpu.memory_space<vmem>>, %arg20: memref<1x32xf32, #tpu.memory_space<vmem>>, %arg21: memref<1x32xf32, #tpu.memory_space<vmem>>, %arg22: memref<1x32xf32, #tpu.memory_space<vmem>>, %arg23: memref<2x16xf32, #tpu.memory_space<vmem>>, %arg24: memref<32x4xf32, #tpu.memory_space<vmem>>, %arg25: memref<2x4xf32, #tpu.memory_space<vmem>>) attributes {dimension_semantics = [#tpu.dimension_semantics<arbitrary>], iteration_bounds = array<i64: 1>, scalar_prefetch = 0 : i64, scratch_operands = 0 : i64, tpu.core_type = #tpu.core_type<tc>, window_params = [{pipeline_mode = #tpu.pipeline_mode<synchronous>, transform_indices = @transform_0, window_bounds = array<i64: 16, 4>}, {pipeline_mode = #tpu.pipeline_mode<synchronous>, transform_indices = @transform_1, window_bounds = array<i64: 4, 32>}, {pipeline_mode = #tpu.pipeline_mode<synchronous>, transform_indices = @transform_2, window_bounds = array<i64: 1, 32>}, {pipeline_mode = #tpu.pipeline_mode<synchronous>, transform_indices = @transform_3, window_bounds = array<i64: 32, 32>}, {pipeline_mode = #tpu.pipeline_mode<synchronous>, transform_indices = @transform_4, window_bounds = array<i64: 1, 32>}, {pipeline_mode = #tpu.pipeline_mode<synchronous>, transform_indices = @transform_5, window_bounds = array<i64: 16, 32>}, {pipeline_mode = #tpu.pipeline_mode<synchronous>, transform_indices = @transform_6, window_bounds = array<i64: 16, 32, 4>}, {pipeline_mode = #tpu.pipeline_mode<synchronous>, transform_indices = @transform_7, window_bounds = array<i64: 16, 1, 4>}, {pipeline_mode = #tpu.pipeline_mode<synchronous>, transform_indices = @transform_8, window_bounds = array<i64: 16, 32, 4>}, {pipeline_mode = #tpu.pipeline_mode<synchronous>, transform_indices = @transform_9, window_bounds = array<i64: 16, 1, 4>}, {pipeline_mode = #tpu.pipeline_mode<synchronous>, transform_indices = @transform_10, window_bounds = array<i64: 16, 32, 4>}, {pipeline_mode = #tpu.pipeline_mode<synchronous>, transform_indices = @transform_11, window_bounds = array<i64: 16, 1, 4>}, {pipeline_mode = #tpu.pipeline_mode<synchronous>, transform_indices = @transform_12, window_bounds = array<i64: 16, 4, 32>}, {pipeline_mode = #tpu.pipeline_mode<synchronous>, transform_indices = @transform_13, window_bounds = array<i64: 1, 32>}, {pipeline_mode = #tpu.pipeline_mode<synchronous>, transform_indices = @transform_14, window_bounds = array<i64: 1, 32>}, {pipeline_mode = #tpu.pipeline_mode<synchronous>, transform_indices = @transform_15, window_bounds = array<i64: 1, 32>}, {pipeline_mode = #tpu.pipeline_mode<synchronous>, transform_indices = @transform_16, window_bounds = array<i64: 32, 64>}, {pipeline_mode = #tpu.pipeline_mode<synchronous>, transform_indices = @transform_17, window_bounds = array<i64: 1, 64>}, {pipeline_mode = #tpu.pipeline_mode<synchronous>, transform_indices = @transform_18, window_bounds = array<i64: 64, 32>}, {pipeline_mode = #tpu.pipeline_mode<synchronous>, transform_indices = @transform_19, window_bounds = array<i64: 1, 32>}, {pipeline_mode = #tpu.pipeline_mode<synchronous>, transform_indices = @transform_20, window_bounds = array<i64: 1, 32>}, {pipeline_mode = #tpu.pipeline_mode<synchronous>, transform_indices = @transform_21, window_bounds = array<i64: 1, 32>}, {pipeline_mode = #tpu.pipeline_mode<synchronous>, transform_indices = @transform_22, window_bounds = array<i64: 2, 16>}, {pipeline_mode = #tpu.pipeline_mode<synchronous>, transform_indices = @transform_23, window_bounds = array<i64: 32, 4>}, {pipeline_mode = #tpu.pipeline_mode<synchronous>, transform_indices = @transform_24, window_bounds = array<i64: 2, 4>}]} {
    %c0 = arith.constant 0 : index
    %c0_0 = arith.constant 0 : index
    %0 = vector.load %arg1[%c0, %c0_0] : memref<16x4xf32, #tpu.memory_space<vmem>>, vector<16x4xf32>
    %c0_1 = arith.constant 0 : index
    %c0_2 = arith.constant 0 : index
    %1 = vector.load %arg2[%c0_1, %c0_2] : memref<4x32xf32, #tpu.memory_space<vmem>>, vector<4x32xf32>
    %cst = arith.constant dense<0.000000e+00> : vector<16x32xf32>
    %2 = tpu.matmul %0, %1, %cst {dimension_numbers = #tpu.dot_dimension_numbers<[1], [0], [0], [1], [0, 0, 1, 1], [], []>} : vector<16x4xf32>, vector<4x32xf32>, vector<16x32xf32> -> vector<16x32xf32>
    %c0_3 = arith.constant 0 : index
    %c0_4 = arith.constant 0 : index
    %3 = vector.load %arg3[%c0_3, %c0_4] : memref<1x32xf32, #tpu.memory_space<vmem>>, vector<1x32xf32>
    %4 = vector.broadcast %3 : vector<1x32xf32> to vector<16x32xf32>
    %5 = arith.addf %2, %4 : vector<16x32xf32>
    %cst_5 = arith.constant 0.000000e+00 : f32
    %6 = vector.broadcast %cst_5 : f32 to vector<16x32xf32>
    %7 = arith.maximumf %5, %6 : vector<16x32xf32>
    %c0_6 = arith.constant 0 : index
    %c0_7 = arith.constant 0 : index
    %8 = vector.load %arg4[%c0_6, %c0_7] : memref<32x32xf32, #tpu.memory_space<vmem>>, vector<32x32xf32>
    %cst_8 = arith.constant dense<0.000000e+00> : vector<16x32xf32>
    %9 = tpu.matmul %7, %8, %cst_8 {dimension_numbers = #tpu.dot_dimension_numbers<[1], [0], [0], [1], [0, 0, 1, 1], [], []>} : vector<16x32xf32>, vector<32x32xf32>, vector<16x32xf32> -> vector<16x32xf32>
    %c0_9 = arith.constant 0 : index
    %c0_10 = arith.constant 0 : index
    %10 = vector.load %arg5[%c0_9, %c0_10] : memref<1x32xf32, #tpu.memory_space<vmem>>, vector<1x32xf32>
    %11 = vector.broadcast %10 : vector<1x32xf32> to vector<16x32xf32>
    %12 = arith.addf %9, %11 : vector<16x32xf32>
    %c0_11 = arith.constant 0 : index
    %c0_12 = arith.constant 0 : index
    %13 = vector.load %arg6[%c0_11, %c0_12] : memref<16x32xf32, #tpu.memory_space<vmem>>, vector<16x32xf32>
    %14 = arith.addf %12, %13 : vector<16x32xf32>
    %15 = vector.shape_cast %14 : vector<16x32xf32> to vector<2x1x8x32xf32>
    %16 = vector.shape_cast %15 : vector<2x1x8x32xf32> to vector<2x1x8x32xf32>
    %17 = vector.broadcast %16 : vector<2x1x8x32xf32> to vector<2x8x8x32xf32>
    %18 = vector.shape_cast %17 : vector<2x8x8x32xf32> to vector<16x8x32xf32>
    %c0_13 = arith.constant 0 : index
    %c0_14 = arith.constant 0 : index
    %c0_15 = arith.constant 0 : index
    %19 = vector.load %arg7[%c0_13, %c0_14, %c0_15] : memref<16x32x4xf32, #tpu.memory_space<vmem>>, vector<16x32x4xf32>
    "tpu.trace_start"() <{level = 10 : i32, message = "gse,ged->gsd"}> : () -> ()
    %cst_16 = arith.constant dense<0.000000e+00> : vector<16x8x4xf32>
    %20 = tpu.matmul %18, %19, %cst_16 {dimension_numbers = #tpu.dot_dimension_numbers<[2], [1], [1], [2], [0, 0, 0, 1, 1, 2], [0], [0]>} : vector<16x8x32xf32>, vector<16x32x4xf32>, vector<16x8x4xf32> -> vector<16x8x4xf32>
    "tpu.trace_stop"() : () -> ()
    %c0_17 = arith.constant 0 : index
    %c0_18 = arith.constant 0 : index
    %c0_19 = arith.constant 0 : index
    %21 = vector.load %arg8[%c0_17, %c0_18, %c0_19] : memref<16x1x4xf32, #tpu.memory_space<vmem>>, vector<16x1x4xf32>
    %22 = vector.broadcast %21 : vector<16x1x4xf32> to vector<16x8x4xf32>
    %23 = arith.addf %20, %22 : vector<16x8x4xf32>
    %c0_20 = arith.constant 0 : index
    %c0_21 = arith.constant 0 : index
    %c0_22 = arith.constant 0 : index
    %24 = vector.load %arg9[%c0_20, %c0_21, %c0_22] : memref<16x32x4xf32, #tpu.memory_space<vmem>>, vector<16x32x4xf32>
    "tpu.trace_start"() <{level = 10 : i32, message = "gse,ged->gsd"}> : () -> ()
    %cst_23 = arith.constant dense<0.000000e+00> : vector<16x8x4xf32>
    %25 = tpu.matmul %18, %24, %cst_23 {dimension_numbers = #tpu.dot_dimension_numbers<[2], [1], [1], [2], [0, 0, 0, 1, 1, 2], [0], [0]>} : vector<16x8x32xf32>, vector<16x32x4xf32>, vector<16x8x4xf32> -> vector<16x8x4xf32>
    "tpu.trace_stop"() : () -> ()
    %c0_24 = arith.constant 0 : index
    %c0_25 = arith.constant 0 : index
    %c0_26 = arith.constant 0 : index
    %26 = vector.load %arg10[%c0_24, %c0_25, %c0_26] : memref<16x1x4xf32, #tpu.memory_space<vmem>>, vector<16x1x4xf32>
    %27 = vector.broadcast %26 : vector<16x1x4xf32> to vector<16x8x4xf32>
    %28 = arith.addf %25, %27 : vector<16x8x4xf32>
    %c0_27 = arith.constant 0 : index
    %c0_28 = arith.constant 0 : index
    %c0_29 = arith.constant 0 : index
    %29 = vector.load %arg11[%c0_27, %c0_28, %c0_29] : memref<16x32x4xf32, #tpu.memory_space<vmem>>, vector<16x32x4xf32>
    "tpu.trace_start"() <{level = 10 : i32, message = "gse,ged->gsd"}> : () -> ()
    %cst_30 = arith.constant dense<0.000000e+00> : vector<16x8x4xf32>
    %30 = tpu.matmul %18, %29, %cst_30 {dimension_numbers = #tpu.dot_dimension_numbers<[2], [1], [1], [2], [0, 0, 0, 1, 1, 2], [0], [0]>} : vector<16x8x32xf32>, vector<16x32x4xf32>, vector<16x8x4xf32> -> vector<16x8x4xf32>
    "tpu.trace_stop"() : () -> ()
    %c0_31 = arith.constant 0 : index
    %c0_32 = arith.constant 0 : index
    %c0_33 = arith.constant 0 : index
    %31 = vector.load %arg12[%c0_31, %c0_32, %c0_33] : memref<16x1x4xf32, #tpu.memory_space<vmem>>, vector<16x1x4xf32>
    %32 = vector.broadcast %31 : vector<16x1x4xf32> to vector<16x8x4xf32>
    %33 = arith.addf %30, %32 : vector<16x8x4xf32>
    "tpu.trace_start"() <{level = 10 : i32, message = "gqd,gkd->gqk"}> : () -> ()
    %cst_34 = arith.constant dense<0.000000e+00> : vector<16x8x8xf32>
    %34 = tpu.matmul %23, %28, %cst_34 {dimension_numbers = #tpu.dot_dimension_numbers<[2], [2], [1], [1], [0, 0, 0, 1, 1, 1], [0], [0]>} : vector<16x8x4xf32>, vector<16x8x4xf32>, vector<16x8x8xf32> -> vector<16x8x8xf32>
    "tpu.trace_stop"() : () -> ()
    %cst_35 = arith.constant dense<0xFF800000> : vector<16x8xf32>
    %35 = vector.multi_reduction <maximumf>, %34, %cst_35 [2] : vector<16x8x8xf32> to vector<16x8xf32>
    %36 = vector.shape_cast %35 : vector<16x8xf32> to vector<16x8x1xf32>
    %37 = vector.broadcast %36 : vector<16x8x1xf32> to vector<16x8x8xf32>
    %38 = arith.subf %34, %37 : vector<16x8x8xf32>
    %39 = math.exp %38 : vector<16x8x8xf32>
    %cst_36 = arith.constant dense<0.000000e+00> : vector<16x8xf32>
    %40 = vector.multi_reduction <add>, %39, %cst_36 [2] : vector<16x8x8xf32> to vector<16x8xf32>
    %41 = vector.shape_cast %40 : vector<16x8xf32> to vector<16x8x1xf32>
    %42 = vector.broadcast %41 : vector<16x8x1xf32> to vector<16x8x8xf32>
    %43 = arith.divf %39, %42 : vector<16x8x8xf32>
    "tpu.trace_start"() <{level = 10 : i32, message = "gqk,gkd->gqd"}> : () -> ()
    %cst_37 = arith.constant dense<0.000000e+00> : vector<16x8x4xf32>
    %44 = tpu.matmul %43, %33, %cst_37 {dimension_numbers = #tpu.dot_dimension_numbers<[2], [1], [1], [2], [0, 0, 0, 1, 1, 2], [0], [0]>} : vector<16x8x8xf32>, vector<16x8x4xf32>, vector<16x8x4xf32> -> vector<16x8x4xf32>
    "tpu.trace_stop"() : () -> ()
    %c0_38 = arith.constant 0 : index
    %c0_39 = arith.constant 0 : index
    %c0_40 = arith.constant 0 : index
    %45 = vector.load %arg13[%c0_38, %c0_39, %c0_40] : memref<16x4x32xf32, #tpu.memory_space<vmem>>, vector<16x4x32xf32>
    "tpu.trace_start"() <{level = 10 : i32, message = "gsd,gde->gse"}> : () -> ()
    %cst_41 = arith.constant dense<0.000000e+00> : vector<16x8x32xf32>
    %46 = tpu.matmul %44, %45, %cst_41 {dimension_numbers = #tpu.dot_dimension_numbers<[2], [1], [1], [2], [0, 0, 0, 1, 1, 2], [0], [0]>} : vector<16x8x4xf32>, vector<16x4x32xf32>, vector<16x8x32xf32> -> vector<16x8x32xf32>
    "tpu.trace_stop"() : () -> ()
    %47 = vector.shape_cast %46 : vector<16x8x32xf32> to vector<2x8x8x32xf32>
    %48 = vector.extract_strided_slice %47 {offsets = [0, 0, 0, 0], sizes = [2, 1, 8, 32], strides = [1, 1, 1, 1]} : vector<2x8x8x32xf32> to vector<2x1x8x32xf32>
    %49 = vector.shape_cast %48 : vector<2x1x8x32xf32> to vector<2x8x32xf32>
    %50 = vector.extract_strided_slice %47 {offsets = [0, 1, 0, 0], sizes = [2, 1, 8, 32], strides = [1, 1, 1, 1]} : vector<2x8x8x32xf32> to vector<2x1x8x32xf32>
    %51 = vector.shape_cast %50 : vector<2x1x8x32xf32> to vector<2x8x32xf32>
    %52 = arith.addf %49, %51 : vector<2x8x32xf32>
    %53 = vector.extract_strided_slice %47 {offsets = [0, 2, 0, 0], sizes = [2, 1, 8, 32], strides = [1, 1, 1, 1]} : vector<2x8x8x32xf32> to vector<2x1x8x32xf32>
    %54 = vector.shape_cast %53 : vector<2x1x8x32xf32> to vector<2x8x32xf32>
    %55 = arith.addf %52, %54 : vector<2x8x32xf32>
    %56 = vector.extract_strided_slice %47 {offsets = [0, 3, 0, 0], sizes = [2, 1, 8, 32], strides = [1, 1, 1, 1]} : vector<2x8x8x32xf32> to vector<2x1x8x32xf32>
    %57 = vector.shape_cast %56 : vector<2x1x8x32xf32> to vector<2x8x32xf32>
    %58 = arith.addf %55, %57 : vector<2x8x32xf32>
    %59 = vector.extract_strided_slice %47 {offsets = [0, 4, 0, 0], sizes = [2, 1, 8, 32], strides = [1, 1, 1, 1]} : vector<2x8x8x32xf32> to vector<2x1x8x32xf32>
    %60 = vector.shape_cast %59 : vector<2x1x8x32xf32> to vector<2x8x32xf32>
    %61 = arith.addf %58, %60 : vector<2x8x32xf32>
    %62 = vector.extract_strided_slice %47 {offsets = [0, 5, 0, 0], sizes = [2, 1, 8, 32], strides = [1, 1, 1, 1]} : vector<2x8x8x32xf32> to vector<2x1x8x32xf32>
    %63 = vector.shape_cast %62 : vector<2x1x8x32xf32> to vector<2x8x32xf32>
    %64 = arith.addf %61, %63 : vector<2x8x32xf32>
    %65 = vector.extract_strided_slice %47 {offsets = [0, 6, 0, 0], sizes = [2, 1, 8, 32], strides = [1, 1, 1, 1]} : vector<2x8x8x32xf32> to vector<2x1x8x32xf32>
    %66 = vector.shape_cast %65 : vector<2x1x8x32xf32> to vector<2x8x32xf32>
    %67 = arith.addf %64, %66 : vector<2x8x32xf32>
    %68 = vector.extract_strided_slice %47 {offsets = [0, 7, 0, 0], sizes = [2, 1, 8, 32], strides = [1, 1, 1, 1]} : vector<2x8x8x32xf32> to vector<2x1x8x32xf32>
    %69 = vector.shape_cast %68 : vector<2x1x8x32xf32> to vector<2x8x32xf32>
    %70 = arith.addf %67, %69 : vector<2x8x32xf32>
    %71 = vector.shape_cast %70 : vector<2x8x32xf32> to vector<16x32xf32>
    %c0_42 = arith.constant 0 : index
    %c0_43 = arith.constant 0 : index
    %72 = vector.load %arg14[%c0_42, %c0_43] : memref<1x32xf32, #tpu.memory_space<vmem>>, vector<1x32xf32>
    %73 = vector.broadcast %72 : vector<1x32xf32> to vector<16x32xf32>
    %74 = arith.addf %71, %73 : vector<16x32xf32>
    %75 = arith.addf %14, %74 : vector<16x32xf32>
    %c0_44 = arith.constant 0 : index
    %c0_45 = arith.constant 0 : index
    %76 = vector.load %arg15[%c0_44, %c0_45] : memref<1x32xf32, #tpu.memory_space<vmem>>, vector<1x32xf32>
    %c0_46 = arith.constant 0 : index
    %c0_47 = arith.constant 0 : index
    %77 = vector.load %arg16[%c0_46, %c0_47] : memref<1x32xf32, #tpu.memory_space<vmem>>, vector<1x32xf32>
    %cst_48 = arith.constant dense<0.000000e+00> : vector<16xf32>
    %78 = vector.multi_reduction <add>, %75, %cst_48 [1] : vector<16x32xf32> to vector<16xf32>
    %79 = vector.shape_cast %78 : vector<16xf32> to vector<16x1xf32>
    %cst_49 = arith.constant 3.200000e+01 : f32
    %80 = vector.broadcast %cst_49 : f32 to vector<16x1xf32>
    %81 = arith.divf %79, %80 : vector<16x1xf32>
    %82 = vector.broadcast %81 : vector<16x1xf32> to vector<16x32xf32>
    %83 = arith.subf %75, %82 : vector<16x32xf32>
    %84 = arith.mulf %83, %83 : vector<16x32xf32>
    %cst_50 = arith.constant dense<0.000000e+00> : vector<16xf32>
    %85 = vector.multi_reduction <add>, %84, %cst_50 [1] : vector<16x32xf32> to vector<16xf32>
    %86 = vector.shape_cast %85 : vector<16xf32> to vector<16x1xf32>
    %cst_51 = arith.constant 3.200000e+01 : f32
    %87 = vector.broadcast %cst_51 : f32 to vector<16x1xf32>
    %88 = arith.divf %86, %87 : vector<16x1xf32>
    %89 = vector.broadcast %81 : vector<16x1xf32> to vector<16x32xf32>
    %90 = arith.subf %75, %89 : vector<16x32xf32>
    %cst_52 = arith.constant 9.99999974E-6 : f32
    %91 = vector.broadcast %cst_52 : f32 to vector<16x1xf32>
    %92 = arith.addf %88, %91 : vector<16x1xf32>
    %93 = math.rsqrt %92 : vector<16x1xf32>
    %94 = vector.broadcast %93 : vector<16x1xf32> to vector<16x32xf32>
    %95 = arith.mulf %90, %94 : vector<16x32xf32>
    %96 = vector.broadcast %76 : vector<1x32xf32> to vector<16x32xf32>
    %97 = arith.mulf %95, %96 : vector<16x32xf32>
    %98 = vector.broadcast %77 : vector<1x32xf32> to vector<16x32xf32>
    %99 = arith.addf %97, %98 : vector<16x32xf32>
    %c0_53 = arith.constant 0 : index
    %c0_54 = arith.constant 0 : index
    %100 = vector.load %arg17[%c0_53, %c0_54] : memref<32x64xf32, #tpu.memory_space<vmem>>, vector<32x64xf32>
    %cst_55 = arith.constant dense<0.000000e+00> : vector<16x64xf32>
    %101 = tpu.matmul %99, %100, %cst_55 {dimension_numbers = #tpu.dot_dimension_numbers<[1], [0], [0], [1], [0, 0, 1, 1], [], []>} : vector<16x32xf32>, vector<32x64xf32>, vector<16x64xf32> -> vector<16x64xf32>
    %c0_56 = arith.constant 0 : index
    %c0_57 = arith.constant 0 : index
    %102 = vector.load %arg18[%c0_56, %c0_57] : memref<1x64xf32, #tpu.memory_space<vmem>>, vector<1x64xf32>
    %103 = vector.broadcast %102 : vector<1x64xf32> to vector<16x64xf32>
    %104 = arith.addf %101, %103 : vector<16x64xf32>
    %cst_58 = arith.constant 0.000000e+00 : f32
    %105 = vector.broadcast %cst_58 : f32 to vector<16x64xf32>
    %106 = arith.maximumf %104, %105 : vector<16x64xf32>
    %c0_59 = arith.constant 0 : index
    %c0_60 = arith.constant 0 : index
    %107 = vector.load %arg19[%c0_59, %c0_60] : memref<64x32xf32, #tpu.memory_space<vmem>>, vector<64x32xf32>
    %cst_61 = arith.constant dense<0.000000e+00> : vector<16x32xf32>
    %108 = tpu.matmul %106, %107, %cst_61 {dimension_numbers = #tpu.dot_dimension_numbers<[1], [0], [0], [1], [0, 0, 1, 1], [], []>} : vector<16x64xf32>, vector<64x32xf32>, vector<16x32xf32> -> vector<16x32xf32>
    %c0_62 = arith.constant 0 : index
    %c0_63 = arith.constant 0 : index
    %109 = vector.load %arg20[%c0_62, %c0_63] : memref<1x32xf32, #tpu.memory_space<vmem>>, vector<1x32xf32>
    %110 = vector.broadcast %109 : vector<1x32xf32> to vector<16x32xf32>
    %111 = arith.addf %108, %110 : vector<16x32xf32>
    %112 = arith.addf %99, %111 : vector<16x32xf32>
    %c0_64 = arith.constant 0 : index
    %c0_65 = arith.constant 0 : index
    %113 = vector.load %arg21[%c0_64, %c0_65] : memref<1x32xf32, #tpu.memory_space<vmem>>, vector<1x32xf32>
    %c0_66 = arith.constant 0 : index
    %c0_67 = arith.constant 0 : index
    %114 = vector.load %arg22[%c0_66, %c0_67] : memref<1x32xf32, #tpu.memory_space<vmem>>, vector<1x32xf32>
    %cst_68 = arith.constant dense<0.000000e+00> : vector<16xf32>
    %115 = vector.multi_reduction <add>, %112, %cst_68 [1] : vector<16x32xf32> to vector<16xf32>
    %116 = vector.shape_cast %115 : vector<16xf32> to vector<16x1xf32>
    %cst_69 = arith.constant 3.200000e+01 : f32
    %117 = vector.broadcast %cst_69 : f32 to vector<16x1xf32>
    %118 = arith.divf %116, %117 : vector<16x1xf32>
    %119 = vector.broadcast %118 : vector<16x1xf32> to vector<16x32xf32>
    %120 = arith.subf %112, %119 : vector<16x32xf32>
    %121 = arith.mulf %120, %120 : vector<16x32xf32>
    %cst_70 = arith.constant dense<0.000000e+00> : vector<16xf32>
    %122 = vector.multi_reduction <add>, %121, %cst_70 [1] : vector<16x32xf32> to vector<16xf32>
    %123 = vector.shape_cast %122 : vector<16xf32> to vector<16x1xf32>
    %cst_71 = arith.constant 3.200000e+01 : f32
    %124 = vector.broadcast %cst_71 : f32 to vector<16x1xf32>
    %125 = arith.divf %123, %124 : vector<16x1xf32>
    %126 = vector.broadcast %118 : vector<16x1xf32> to vector<16x32xf32>
    %127 = arith.subf %112, %126 : vector<16x32xf32>
    %cst_72 = arith.constant 9.99999974E-6 : f32
    %128 = vector.broadcast %cst_72 : f32 to vector<16x1xf32>
    %129 = arith.addf %125, %128 : vector<16x1xf32>
    %130 = math.rsqrt %129 : vector<16x1xf32>
    %131 = vector.broadcast %130 : vector<16x1xf32> to vector<16x32xf32>
    %132 = arith.mulf %127, %131 : vector<16x32xf32>
    %133 = vector.broadcast %113 : vector<1x32xf32> to vector<16x32xf32>
    %134 = arith.mulf %132, %133 : vector<16x32xf32>
    %135 = vector.broadcast %114 : vector<1x32xf32> to vector<16x32xf32>
    %136 = arith.addf %134, %135 : vector<16x32xf32>
    %c0_73 = arith.constant 0 : index
    %c0_74 = arith.constant 0 : index
    %137 = vector.load %arg23[%c0_73, %c0_74] : memref<2x16xf32, #tpu.memory_space<vmem>>, vector<2x16xf32>
    %cst_75 = arith.constant dense<0.000000e+00> : vector<2x32xf32>
    %138 = tpu.matmul %137, %136, %cst_75 {dimension_numbers = #tpu.dot_dimension_numbers<[1], [0], [0], [1], [0, 0, 1, 1], [], []>} : vector<2x16xf32>, vector<16x32xf32>, vector<2x32xf32> -> vector<2x32xf32>
    %c0_76 = arith.constant 0 : index
    %c0_77 = arith.constant 0 : index
    %139 = vector.load %arg24[%c0_76, %c0_77] : memref<32x4xf32, #tpu.memory_space<vmem>>, vector<32x4xf32>
    %cst_78 = arith.constant dense<0.000000e+00> : vector<2x4xf32>
    %140 = tpu.matmul %138, %139, %cst_78 {dimension_numbers = #tpu.dot_dimension_numbers<[1], [0], [0], [1], [0, 0, 1, 1], [], []>} : vector<2x32xf32>, vector<32x4xf32>, vector<2x4xf32> -> vector<2x4xf32>
    %c0_79 = arith.constant 0 : index
    %c0_80 = arith.constant 0 : index
    %141 = vector.load %arg25[%c0_79, %c0_80] : memref<2x4xf32, #tpu.memory_space<vmem>>, vector<2x4xf32>
    tpu.vector_store %arg25[%c0_79, %c0_80], %140 {strides = array<i32>} : memref<2x4xf32, #tpu.memory_space<vmem>>, vector<2x4xf32>,
    return
  }
  func.func @transform_0(%arg0: i32) -> (i32, i32) {
    %c0_i32 = arith.constant 0 : i32
    %c0_i32_0 = arith.constant 0 : i32
    %c0_i32_1 = arith.constant 0 : i32
    return %c0_i32, %c0_i32_0 : i32, i32
  }
  func.func @transform_1(%arg0: i32) -> (i32, i32) {
    %c0_i32 = arith.constant 0 : i32
    %c0_i32_0 = arith.constant 0 : i32
    %c0_i32_1 = arith.constant 0 : i32
    return %c0_i32, %c0_i32_0 : i32, i32
  }
  func.func @transform_2(%arg0: i32) -> (i32, i32) {
    %c0_i32 = arith.constant 0 : i32
    %c0_i32_0 = arith.constant 0 : i32
    %c0_i32_1 = arith.constant 0 : i32
    return %c0_i32, %c0_i32_0 : i32, i32
  }
  func.func @transform_3(%arg0: i32) -> (i32, i32) {
    %c0_i32 = arith.constant 0 : i32
    %c0_i32_0 = arith.constant 0 : i32
    %c0_i32_1 = arith.constant 0 : i32
    return %c0_i32, %c0_i32_0 : i32, i32
  }
  func.func @transform_4(%arg0: i32) -> (i32, i32) {
    %c0_i32 = arith.constant 0 : i32
    %c0_i32_0 = arith.constant 0 : i32
    %c0_i32_1 = arith.constant 0 : i32
    return %c0_i32, %c0_i32_0 : i32, i32
  }
  func.func @transform_5(%arg0: i32) -> (i32, i32) {
    %c0_i32 = arith.constant 0 : i32
    %c0_i32_0 = arith.constant 0 : i32
    %c0_i32_1 = arith.constant 0 : i32
    return %c0_i32, %c0_i32_0 : i32, i32
  }
  func.func @transform_6(%arg0: i32) -> (i32, i32, i32) {
    %c0_i32 = arith.constant 0 : i32
    %c0_i32_0 = arith.constant 0 : i32
    %c0_i32_1 = arith.constant 0 : i32
    %c0_i32_2 = arith.constant 0 : i32
    return %c0_i32, %c0_i32_0, %c0_i32_1 : i32, i32, i32
  }
  func.func @transform_7(%arg0: i32) -> (i32, i32, i32) {
    %c0_i32 = arith.constant 0 : i32
    %c0_i32_0 = arith.constant 0 : i32
    %c0_i32_1 = arith.constant 0 : i32
    %c0_i32_2 = arith.constant 0 : i32
    return %c0_i32, %c0_i32_0, %c0_i32_1 : i32, i32, i32
  }
  func.func @transform_8(%arg0: i32) -> (i32, i32, i32) {
    %c0_i32 = arith.constant 0 : i32
    %c0_i32_0 = arith.constant 0 : i32
    %c0_i32_1 = arith.constant 0 : i32
    %c0_i32_2 = arith.constant 0 : i32
    return %c0_i32, %c0_i32_0, %c0_i32_1 : i32, i32, i32
  }
  func.func @transform_9(%arg0: i32) -> (i32, i32, i32) {
    %c0_i32 = arith.constant 0 : i32
    %c0_i32_0 = arith.constant 0 : i32
    %c0_i32_1 = arith.constant 0 : i32
    %c0_i32_2 = arith.constant 0 : i32
    return %c0_i32, %c0_i32_0, %c0_i32_1 : i32, i32, i32
  }
  func.func @transform_10(%arg0: i32) -> (i32, i32, i32) {
    %c0_i32 = arith.constant 0 : i32
    %c0_i32_0 = arith.constant 0 : i32
    %c0_i32_1 = arith.constant 0 : i32
    %c0_i32_2 = arith.constant 0 : i32
    return %c0_i32, %c0_i32_0, %c0_i32_1 : i32, i32, i32
  }
  func.func @transform_11(%arg0: i32) -> (i32, i32, i32) {
    %c0_i32 = arith.constant 0 : i32
    %c0_i32_0 = arith.constant 0 : i32
    %c0_i32_1 = arith.constant 0 : i32
    %c0_i32_2 = arith.constant 0 : i32
    return %c0_i32, %c0_i32_0, %c0_i32_1 : i32, i32, i32
  }
  func.func @transform_12(%arg0: i32) -> (i32, i32, i32) {
    %c0_i32 = arith.constant 0 : i32
    %c0_i32_0 = arith.constant 0 : i32
    %c0_i32_1 = arith.constant 0 : i32
    %c0_i32_2 = arith.constant 0 : i32
    return %c0_i32, %c0_i32_0, %c0_i32_1 : i32, i32, i32
  }
  func.func @transform_13(%arg0: i32) -> (i32, i32) {
    %c0_i32 = arith.constant 0 : i32
    %c0_i32_0 = arith.constant 0 : i32
    %c0_i32_1 = arith.constant 0 : i32
    return %c0_i32, %c0_i32_0 : i32, i32
  }
  func.func @transform_14(%arg0: i32) -> (i32, i32) {
    %c0_i32 = arith.constant 0 : i32
    %c0_i32_0 = arith.constant 0 : i32
    %c0_i32_1 = arith.constant 0 : i32
    return %c0_i32, %c0_i32_0 : i32, i32
  }
  func.func @transform_15(%arg0: i32) -> (i32, i32) {
    %c0_i32 = arith.constant 0 : i32
    %c0_i32_0 = arith.constant 0 : i32
    %c0_i32_1 = arith.constant 0 : i32
    return %c0_i32, %c0_i32_0 : i32, i32
  }
  func.func @transform_16(%arg0: i32) -> (i32, i32) {
    %c0_i32 = arith.constant 0 : i32
    %c0_i32_0 = arith.constant 0 : i32
    %c0_i32_1 = arith.constant 0 : i32
    return %c0_i32, %c0_i32_0 : i32, i32
  }
  func.func @transform_17(%arg0: i32) -> (i32, i32) {
    %c0_i32 = arith.constant 0 : i32
    %c0_i32_0 = arith.constant 0 : i32
    %c0_i32_1 = arith.constant 0 : i32
    return %c0_i32, %c0_i32_0 : i32, i32
  }
  func.func @transform_18(%arg0: i32) -> (i32, i32) {
    %c0_i32 = arith.constant 0 : i32
    %c0_i32_0 = arith.constant 0 : i32
    %c0_i32_1 = arith.constant 0 : i32
    return %c0_i32, %c0_i32_0 : i32, i32
  }
  func.func @transform_19(%arg0: i32) -> (i32, i32) {
    %c0_i32 = arith.constant 0 : i32
    %c0_i32_0 = arith.constant 0 : i32
    %c0_i32_1 = arith.constant 0 : i32
    return %c0_i32, %c0_i32_0 : i32, i32
  }
  func.func @transform_20(%arg0: i32) -> (i32, i32) {
    %c0_i32 = arith.constant 0 : i32
    %c0_i32_0 = arith.constant 0 : i32
    %c0_i32_1 = arith.constant 0 : i32
    return %c0_i32, %c0_i32_0 : i32, i32
  }
  func.func @transform_21(%arg0: i32) -> (i32, i32) {
    %c0_i32 = arith.constant 0 : i32
    %c0_i32_0 = arith.constant 0 : i32
    %c0_i32_1 = arith.constant 0 : i32
    return %c0_i32, %c0_i32_0 : i32, i32
  }
  func.func @transform_22(%arg0: i32) -> (i32, i32) {
    %c0_i32 = arith.constant 0 : i32
    %c0_i32_0 = arith.constant 0 : i32
    %c0_i32_1 = arith.constant 0 : i32
    return %c0_i32, %c0_i32_0 : i32, i32
  }
  func.func @transform_23(%arg0: i32) -> (i32, i32) {
    %c0_i32 = arith.constant 0 : i32
    %c0_i32_0 = arith.constant 0 : i32
    %c0_i32_1 = arith.constant 0 : i32
    return %c0_i32, %c0_i32_0 : i32, i32
  }
  func.func @transform_24(%arg0: i32) -> (i32, i32) {
    %c0_i32 = arith.constant 0 : i32
    %c0_i32_0 = arith.constant 0 : i32
    %c0_i32_1 = arith.constant 0 : i32
    return %c0_i32, %c0_i32_0 : i32, i32
  }
}

</mosaic_0001>

<bundles_post_ra>
// kernel: tpu_custom_call.1
= control target key start
LH: loop header
LB: loop body
LE: loop exit
PB: predicated region body
PF: predicated region fallthrough
CT: control target
= control target key end

     0   :  { %s5415_s0 = inlined_call_operand.vmem [shape: f32[16,4], index: 0, kind: input, shape index: {}]   ;;  %s5416_s1 = inlined_call_operand.vmem [shape: f32[4,32], index: 1, kind: input, shape index: {}]   ;;  %s5417_s2 = inlined_call_operand.vmem [shape: f32[1,32], index: 2, kind: input, shape index: {}]   ;;  %s5418_s3 = inlined_call_operand.vmem [shape: f32[32,32], index: 3, kind: input, shape index: {}]   ;;  %s5419_s4 = inlined_call_operand.vmem [shape: f32[1,32], index: 4, kind: input, shape index: {}]   ;;  %s5420_s5 = inlined_call_operand.vmem [shape: f32[16,32], index: 5, kind: input, shape index: {}]   ;;  %s5421_s6 = inlined_call_operand.vmem [shape: f32[16,32,4], index: 6, kind: input, shape index: {}]   ;;  %s5422_s7 = inlined_call_operand.vmem [shape: f32[16,1,4], index: 7, kind: input, shape index: {}]   ;;  %s5423_s8 = inlined_call_operand.vmem [shape: f32[16,32,4], index: 8, kind: input, shape index: {}]   ;;  %s5424_s9 = inlined_call_operand.vmem [shape: f32[16,1,4], index: 9, kind: input, shape index: {}]   ;;  %s5425_s10 = inlined_call_operand.vmem [shape: f32[16,32,4], index: 10, kind: input, shape index: {}]   ;;  %s5426_s11 = inlined_call_operand.vmem [shape: f32[16,1,4], index: 11, kind: input, shape index: {}]   ;;  %s5427_s12 = inlined_call_operand.vmem [shape: f32[16,4,32], index: 12, kind: input, shape index: {}]   ;;  %s5428_s13 = inlined_call_operand.vmem [shape: f32[1,32], index: 13, kind: input, shape index: {}]   ;;  %s5429_s14 = inlined_call_operand.vmem [shape: f32[1,32], index: 14, kind: input, shape index: {}]   ;;  %s5430_s15 = inlined_call_operand.vmem [shape: f32[1,32], index: 15, kind: input, shape index: {}]   ;;  %s5431_s16 = inlined_call_operand.vmem [shape: f32[32,64], index: 16, kind: input, shape index: {}]   ;;  %s5432_s17 = inlined_call_operand.vmem [shape: f32[1,64], index: 17, kind: input, shape index: {}]   ;;  %s5433_s18 = inlined_call_operand.vmem [shape: f32[64,32], index: 18, kind: input, shape index: {}]   ;;  %s5434_s19 = inlined_call_operand.vmem [shape: f32[1,32], index: 19, kind: input, shape index: {}]   ;;  %s5435_s20 = inlined_call_operand.vmem [shape: f32[1,32], index: 20, kind: input, shape index: {}]   ;;  %s5436_s21 = inlined_call_operand.vmem [shape: f32[1,32], index: 21, kind: input, shape index: {}]   ;;  %s5437_s22 = inlined_call_operand.vmem [shape: f32[2,16], index: 22, kind: input, shape index: {}]   ;;  %s5438_s23 = inlined_call_operand.vmem [shape: f32[32,4], index: 23, kind: input, shape index: {}]   ;;  %s5439_s24 = inlined_call_operand.hbm [shape: f32[2,4], index: 24, kind: output, shape index: {}]  }
   0x1   :  { %5446 = sst [smem:[#allocation5_spill]] %s5415_s0 }
   0x2   :  { %5447 = sst [smem:[#allocation6_spill]] %s5416_s1 }
   0x3   :  { %5448 = sst [smem:[#allocation7_spill]] %s5417_s2 }
   0x4   :  { %5449 = sst [smem:[#allocation8_spill]] %s5418_s3 }
   0x5   :  { %5450 = sst [smem:[#allocation9_spill]] %s5419_s4 }
   0x6   :  { %5451 = sst [smem:[#allocation10_spill]] %s5420_s5 }
   0x7   :  { %5452 = sst [smem:[#allocation11_spill]] %s5421_s6 }
   0x8   :  { %5453 = sst [smem:[#allocation12_spill]] %s5422_s7 }
   0x9   :  { %5454 = sst [smem:[#allocation13_spill]] %s5423_s8 }
   0xa   :  { %s5455_s27 = sld [smem:[#allocation6_spill]]  ;;  %vm92_vm0 = vcmask 1043456   ;;  %vm85_vm1 = vcmask 31744  }
   0xb   :  { %s5456_s2 = sld [smem:[#allocation5_spill]] }
   0xc   :  { %s5457_s7 = sld [smem:[#allocation8_spill]] }
  0x10   :  { %v80_v0 = vld [vmem:[%s5455_s27] sm:$0xf] }
  0x11   :  { %v78_v1 = vld [vmem:[%s5456_s2] sm:$0xff]  ;;  %3408 = vmatpush.msk.msra.mxu0 %vm92_vm0, %v80_v0  ;;  %v79_v3 = vld [vmem:[%s5456_s2 + $0x8] sm:$0xff] }
  0x12   :  { %v124_v2 = vld [vmem:[%s5457_s7 + $0x18] sm:$0xff]  ;;  %3409 = vmatmul.msk.f32.vlgmr.msra.gmra.mxu0 %vm85_vm1, %v78_v1 }
  0x13   :  { %148 = vmatpush.msra.mxu1 %v124_v2  ;;  %3547 = vmatpush.msra.mxu2 %v124_v2 }
  0x1a   :  { %3410 = vmatmul.msk.f32.gmra.mxu0 %vm85_vm1, %v79_v3 }
  0x1b   :  { %29 = vsyncpa [#allocation3], 0  ;;  %v123_v4 = vld [vmem:[%s5457_s7 + $0x10] sm:$0xff]  ;;  %v122_v5 = vld [vmem:[%s5457_s7 + $0x8] sm:$0xff]  ;;  %s5458_s6 = sld [smem:[#allocation11_spill]]  ;;  %vm129_vm2 = vcmask 261120  }
  0x1c   :  { %149 = vmatpush.msra.mxu1 %v123_v4  ;;  %3548 = vmatpush.msra.mxu2 %v123_v4  ;;  %v121_v6 = vld [vmem:[%s5457_s7] sm:$0xff]  ;;  %s5459_s4 = sld [smem:[#allocation7_spill]]  ;;  %vm1929_vm3 = vcmask 64512  }
  0x1d   :  { %s5460_s26 = sld [smem:[#allocation9_spill]] }
  0x1e   :  { %150 = vmatpush.msra.mxu1 %v122_v5  ;;  %3549 = vmatpush.msra.mxu2 %v122_v5  ;;  %s5461_s2 = sld [smem:[#allocation10_spill]] }
  0x1f   :  { %s5462_s28 = sld [smem:[#allocation13_spill]] }
  0x20   :  { %151 = vmatpush.msra.mxu1 %v121_v6  ;;  %3550 = vmatpush.msra.mxu2 %v121_v6 }
  0x21   :  { %v166_v7 = vld [vmem:[%s5458_s6 + $0x18] sm:$0xff]  ;;  %v165_v18 = vld [vmem:[%s5458_s6 + $0x10] sm:$0xff]  ;;  %v164_v22 = vld [vmem:[%s5458_s6 + $0x8] sm:$0xff] }
  0x22   :  { %v170_v8 = vld [vmem:[%s5458_s6 + $0x38] sm:$0xff]  ;;  %306 = vmatpush.msrb.mxu2 %v166_v7  ;;  %v3553_v11 = vld [vmem:[%s5459_s4] ss:$0 sm:$0xff]  ;;  %v169_v19 = vld [vmem:[%s5458_s6 + $0x30] sm:$0xff] }
  0x23   :  { %v182_v9 = vld [vmem:[%s5458_s6 + $0x98] sm:$0xff]  ;;  %326 = vmatpush.msra.mxu3 %v170_v8  ;;  %v181_v20 = vld [vmem:[%s5458_s6 + $0x90] sm:$0xff]  ;;  %v168_v23 = vld [vmem:[%s5458_s6 + $0x28] sm:$0xff] }
  0x24   :  { %v186_v10 = vld [vmem:[%s5458_s6 + $0xb8] sm:$0xff]  ;;  %386 = vmatpush.msrb.mxu0 %v182_v9  ;;  %307 = vmatpush.msrb.mxu2 %v165_v18  ;;  %v185_v21 = vld [vmem:[%s5458_s6 + $0xb0] sm:$0xff]  ;;  %v180_v24 = vld [vmem:[%s5458_s6 + $0x88] sm:$0xff] }
  0x25   :  { %406 = vmatpush.msrb.mxu1 %v186_v10  ;;  %327 = vmatpush.msra.mxu3 %v169_v19  ;;  %v184_v25 = vld [vmem:[%s5458_s6 + $0xa8] sm:$0xff]  ;;  %v163_v26 = vld [vmem:[%s5458_s6] sm:$0xff]  ;;  %v174_v30 = vld [vmem:[%s5458_s6 + $0x58] sm:$0xff] }
  0x26   :  { %387 = vmatpush.msrb.mxu0 %v181_v20  ;;  %308 = vmatpush.msrb.mxu2 %v164_v22  ;;  %v167_v27 = vld [vmem:[%s5458_s6 + $0x20] sm:$0xff]  ;;  %v178_v31 = vld [vmem:[%s5458_s6 + $0x78] sm:$0xff]  ;;  %v173_v32 = vld [vmem:[%s5458_s6 + $0x50] sm:$0xff] }
  0x27   :  { %407 = vmatpush.msrb.mxu1 %v185_v21  ;;  %328 = vmatpush.msra.mxu3 %v168_v23  ;;  %v179_v28 = vld [vmem:[%s5458_s6 + $0x80] sm:$0xff]  ;;  %v177_v33 = vld [vmem:[%s5458_s6 + $0x70] sm:$0xff]  ;;  %v172_v34 = vld [vmem:[%s5458_s6 + $0x48] sm:$0xff] }
  0x28   :  { %388 = vmatpush.msrb.mxu0 %v180_v24  ;;  %309 = vmatpush.msrb.mxu2 %v163_v26  ;;  %v183_v29 = vld [vmem:[%s5458_s6 + $0xa0] sm:$0xff]  ;;  %v176_v35 = vld [vmem:[%s5458_s6 + $0x68] sm:$0xff]  ;;  %v198_v36 = vld [vmem:[%s5458_s6 + $0x118] sm:$0xff] }
  0x29   :  { %408 = vmatpush.msrb.mxu1 %v184_v25  ;;  %329 = vmatpush.msra.mxu3 %v167_v27  ;;  %v202_v37 = vld [vmem:[%s5458_s6 + $0x138] sm:$0xff]  ;;  %v171_v38 = vld [vmem:[%s5458_s6 + $0x40] sm:$0xff]  ;;  %v197_v40 = vld [vmem:[%s5458_s6 + $0x110] sm:$0xff] }
  0x2a   :  { %389 = vmatpush.msrb.mxu0 %v179_v28  ;;  %v175_v39 = vld [vmem:[%s5458_s6 + $0x60] sm:$0xff]  ;;  %v201_v41 = vld [vmem:[%s5458_s6 + $0x130] sm:$0xff]  ;;  %v196_v42 = vld [vmem:[%s5458_s6 + $0x108] sm:$0xff] }
  0x2b   :  { %409 = vmatpush.msrb.mxu1 %v183_v29  ;;  %366 = vmatpush.msrb.mxu3 %v178_v31  ;;  %v200_v43 = vld [vmem:[%s5458_s6 + $0x128] sm:$0xff]  ;;  %v195_v44 = vld [vmem:[%s5458_s6 + $0x100] sm:$0xff]  ;;  %v190_v51 = vld [vmem:[%s5458_s6 + $0xd8] sm:$0xff] }
  0x2c   :  { %469 = vmatpush.msra.mxu0 %v198_v36  ;;  %v199_v45 = vld [vmem:[%s5458_s6 + $0x120] sm:$0xff]  ;;  %v194_v52 = vld [vmem:[%s5458_s6 + $0xf8] sm:$0xff]  ;;  %v189_v55 = vld [vmem:[%s5458_s6 + $0xd0] sm:$0xff] }
  0x2d   :  { %367 = vmatpush.msrb.mxu3 %v177_v33  ;;  %v3554_v46 = vld [vmem:[%s5460_s26] ss:$0 sm:$0xff]  ;;  %v214_v53 = vld [vmem:[%s5458_s6 + $0x198] sm:$0xff]  ;;  %v193_v56 = vld [vmem:[%s5458_s6 + $0xf0] sm:$0xff] }
  0x2e   :  { %470 = vmatpush.msra.mxu0 %v197_v40  ;;  %v159_v48 = vld [vmem:[%s5461_s2] sm:$0xff]  ;;  %v218_v54 = vld [vmem:[%s5458_s6 + $0x1b8] sm:$0xff]  ;;  %v213_v57 = vld [vmem:[%s5458_s6 + $0x190] sm:$0xff] }
  0x2f   :  { %368 = vmatpush.msrb.mxu3 %v176_v35  ;;  %v217_v58 = vld [vmem:[%s5458_s6 + $0x1b0] sm:$0xff]  ;;  %v188_v59 = vld [vmem:[%s5458_s6 + $0xc8] sm:$0xff]  ;;  %v187_v63 = vld [vmem:[%s5458_s6 + $0xc0] sm:$0xff] }
  0x30   :  { %471 = vmatpush.msra.mxu0 %v196_v42  ;;  %v192_v60 = vld [vmem:[%s5458_s6 + $0xe8] sm:$0xff]  ;;  %v191_v0 = vld [vmem:[%s5458_s6 + $0xe0] sm:$0xff]  ;;  %v206_v1 = vld [vmem:[%s5458_s6 + $0x158] sm:$0xff] }
  0x31   :  { %369 = vmatpush.msrb.mxu3 %v175_v39  ;;  %v212_v61 = vld [vmem:[%s5458_s6 + $0x188] sm:$0xff]  ;;  %v210_v2 = vld [vmem:[%s5458_s6 + $0x178] sm:$0xff]  ;;  %v211_v3 = vld [vmem:[%s5458_s6 + $0x180] sm:$0xff] }
  0x32   :  { %472 = vmatpush.msra.mxu0 %v195_v44  ;;  %v216_v62 = vld [vmem:[%s5458_s6 + $0x1a8] sm:$0xff]  ;;  %v215_v4 = vld [vmem:[%s5458_s6 + $0x1a0] sm:$0xff]  ;;  %v205_v7 = vld [vmem:[%s5458_s6 + $0x150] sm:$0xff] }
  0x33   :  { %v160_v6 = vld [vmem:[%s5461_s2 + $0x8] sm:$0xff]  ;;  %v209_v8 = vld [vmem:[%s5458_s6 + $0x170] sm:$0xff]  ;;  %v226_v18 = vld [vmem:[%s5458_s6 + $0x1f8] sm:$0xff]  ;;  %s5463_s2 = sld [smem:[#allocation12_spill]] }
  0x34   :  { %v619_v19 = vld [vmem:[%s5462_s28 + $0x10] sm:$0xff]  ;;  %v618_v23 = vld [vmem:[%s5462_s28 + $0x8] sm:$0xff]  ;;  %v617_v27 = vld [vmem:[%s5462_s28] sm:$0xff] }
  0x35   :  { %v623_v20 = vld [vmem:[%s5462_s28 + $0x30] sm:$0xff]  ;;  %v622_v24 = vld [vmem:[%s5462_s28 + $0x28] sm:$0xff]  ;;  %v621_v28 = vld [vmem:[%s5462_s28 + $0x20] sm:$0xff] }
  0x36   :  { %v221_v21 = vld [vmem:[%s5458_s6 + $0x1d0] sm:$0xff]  ;;  %v220_v25 = vld [vmem:[%s5458_s6 + $0x1c8] sm:$0xff]  ;;  %v219_v29 = vld [vmem:[%s5458_s6 + $0x1c0] sm:$0xff] }
  0x37   :  { %v225_v22 = vld [vmem:[%s5458_s6 + $0x1f0] sm:$0xff]  ;;  %v224_v26 = vld [vmem:[%s5458_s6 + $0x1e8] sm:$0xff]  ;;  %v636_v31 = vld [vmem:[%s5462_s28 + $0x98] sm:$0xff] }
  0x38   :  { %v628_v33 = vld [vmem:[%s5462_s28 + $0x58] sm:$0xff]  ;;  %v635_v35 = vld [vmem:[%s5462_s28 + $0x90] sm:$0xff]  ;;  %v634_v39 = vld [vmem:[%s5462_s28 + $0x88] sm:$0xff] }
  0x39   :  { %v639_v36 = vld [vmem:[%s5462_s28 + $0xb0] sm:$0xff]  ;;  %v638_v40 = vld [vmem:[%s5462_s28 + $0xa8] sm:$0xff]  ;;  %v637_v44 = vld [vmem:[%s5462_s28 + $0xa0] sm:$0xff] }
  0x3a   :  { %v630_v42 = vld [vmem:[%s5462_s28 + $0x68] sm:$0xff] }
  0x8f   :  { %v113_v12 = vpop.f32.mrf.mxu0 }
  0x90   :  { %v114_v13 = vadd.f32 %v3553_v11, %v113_v12  ;;  %v208_v12 = vld [vmem:[%s5458_s6 + $0x168] sm:$0xff] }
  0x92   :  { %v119_v14 = vmax.f32 %v114_v13, 0.0  ;;  %v203_v13 = vld [vmem:[%s5458_s6 + $0x140] sm:$0xff] }
  0x94   :  { %3411 = vmatmul.msk.f32.vlgmr.msra.gmra.mxu1 %vm129_vm2, %v119_v14  ;;  %v207_v14 = vld [vmem:[%s5458_s6 + $0x160] sm:$0xff] }
  0x95   :  { %489 = vmatpush.msra.mxu1 %v202_v37  ;;  %v627_v37 = vld [vmem:[%s5462_s28 + $0x50] sm:$0xff] }
  0x97   :  { %v116_v15 = vpop.f32.mrf.mxu0  ;;  %490 = vmatpush.msra.mxu1 %v201_v41  ;;  %v626_v41 = vld [vmem:[%s5462_s28 + $0x48] sm:$0xff] }
  0x98   :  { %v117_v16 = vadd.f32 %v3553_v11, %v116_v15  ;;  %v204_v11 = vld [vmem:[%s5458_s6 + $0x148] sm:$0xff]  ;;  %v620_v15 = vld [vmem:[%s5462_s28 + $0x18] sm:$0xff] }
  0x99   :  { %491 = vmatpush.msra.mxu1 %v200_v43  ;;  %v633_v43 = vld [vmem:[%s5462_s28 + $0x80] sm:$0xff] }
  0x9a   :  { %v120_v17 = vmax.f32 %v117_v16, 0.0  ;;  %v624_v16 = vld [vmem:[%s5462_s28 + $0x38] sm:$0xff] }
  0x9b   :  { %492 = vmatpush.msra.mxu1 %v199_v45  ;;  %v625_v45 = vld [vmem:[%s5462_s28 + $0x40] sm:$0xff] }
  0x9c   :  { %3412 = vmatmul.msk.f32.vlgmr.msra.gmra.mxu2 %vm129_vm2, %v120_v17  ;;  %v222_v17 = vld [vmem:[%s5458_s6 + $0x1d8] sm:$0xff] }
  0x9d   :  { %346 = vmatpush.msra.mxu2 %v174_v30  ;;  %v223_v30 = vld [vmem:[%s5458_s6 + $0x1e0] sm:$0xff] }
  0x9f   :  { %347 = vmatpush.msra.mxu2 %v173_v32  ;;  %v640_v32 = vld [vmem:[%s5462_s28 + $0xb8] sm:$0xff] }
  0xa1   :  { %348 = vmatpush.msra.mxu2 %v172_v34  ;;  %v632_v34 = vld [vmem:[%s5462_s28 + $0x78] sm:$0xff] }
  0xa3   :  { %349 = vmatpush.msra.mxu2 %v171_v38  ;;  %v631_v38 = vld [vmem:[%s5462_s28 + $0x70] sm:$0xff] }
 0x111   :  { %v153_v47 = vpop.f32.mrf.mxu1 }
 0x112   :  { %v154_v49 = vadd.f32 %v3554_v46, %v153_v47  ;;  %v652_v47 = vld [vmem:[%s5462_s28 + $0x118] sm:$0xff] }
 0x114   :  { %v3968_v50 = vadd.f32 %v159_v48, %v154_v49  ;;  %v656_v48 = vld [vmem:[%s5462_s28 + $0x138] sm:$0xff] }
 0x115   :  { %v644_v49 = vld [vmem:[%s5462_s28 + $0xd8] sm:$0xff] }
 0x116   :  { %3413 = vmatmul.msk.f32.vlgmr.msrb.gmra.mxu2 %vm129_vm2, %v3968_v50  ;;  %3414 = vmatmul.msk.f32.vlgmr.msra.gmra.mxu3 %vm129_vm2, %v3968_v50 }
 0x117   :  { %3417 = vmatmul.msk.f32.vlgmr.msrb.gmra.mxu0 %vm129_vm2, %v3968_v50  ;;  %3418 = vmatmul.msk.f32.vlgmr.msrb.gmra.mxu1 %vm129_vm2, %v3968_v50 }
 0x118   :  { %426 = vmatpush.msrb.mxu2 %v190_v51  ;;  %446 = vmatpush.msra.mxu3 %v194_v52  ;;  %v648_v51 = vld [vmem:[%s5462_s28 + $0xf8] sm:$0xff]  ;;  %v651_v52 = vld [vmem:[%s5462_s28 + $0x110] sm:$0xff] }
 0x119   :  { %549 = vmatpush.msrb.mxu0 %v214_v53  ;;  %569 = vmatpush.msrb.mxu1 %v218_v54  ;;  %v655_v53 = vld [vmem:[%s5462_s28 + $0x130] sm:$0xff] }
 0x11a   :  { %427 = vmatpush.msrb.mxu2 %v189_v55  ;;  %447 = vmatpush.msra.mxu3 %v193_v56  ;;  %v643_v54 = vld [vmem:[%s5462_s28 + $0xd0] sm:$0xff]  ;;  %v650_v56 = vld [vmem:[%s5462_s28 + $0x108] sm:$0xff] }
 0x11b   :  { %550 = vmatpush.msrb.mxu0 %v213_v57  ;;  %570 = vmatpush.msrb.mxu1 %v217_v58  ;;  %v647_v55 = vld [vmem:[%s5462_s28 + $0xf0] sm:$0xff]  ;;  %v654_v57 = vld [vmem:[%s5462_s28 + $0x128] sm:$0xff] }
 0x11c   :  { %428 = vmatpush.msrb.mxu2 %v188_v59  ;;  %448 = vmatpush.msra.mxu3 %v192_v60  ;;  %v642_v58 = vld [vmem:[%s5462_s28 + $0xc8] sm:$0xff]  ;;  %v649_v60 = vld [vmem:[%s5462_s28 + $0x100] sm:$0xff] }
 0x11d   :  { %551 = vmatpush.msrb.mxu0 %v212_v61  ;;  %571 = vmatpush.msrb.mxu1 %v216_v62  ;;  %v646_v59 = vld [vmem:[%s5462_s28 + $0xe8] sm:$0xff]  ;;  %v653_v61 = vld [vmem:[%s5462_s28 + $0x120] sm:$0xff] }
 0x11e   :  { %3415 = vmatmul.msk.f32.vlgmr.msra.gmra.mxu2 %vm129_vm2, %v3968_v50  ;;  %3416 = vmatmul.msk.f32.vlgmr.msrb.gmra.mxu3 %vm129_vm2, %v3968_v50  ;;  %v641_v62 = vld [vmem:[%s5462_s28 + $0xc0] sm:$0xff] }
 0x11f   :  { %v156_v5 = vpop.f32.mrf.mxu2  ;;  %429 = vmatpush.msrb.mxu2 %v187_v63  ;;  %449 = vmatpush.msra.mxu3 %v191_v0  ;;  %v645_v63 = vld [vmem:[%s5462_s28 + $0xe0] sm:$0xff]  ;;  %v668_v0 = vld [vmem:[%s5462_s28 + $0x198] sm:$0xff] }
 0x120   :  { %v157_v9 = vadd.f32 %v3554_v46, %v156_v5  ;;  %552 = vmatpush.msrb.mxu0 %v211_v3  ;;  %572 = vmatpush.msrb.mxu1 %v215_v4  ;;  %v629_v46 = vld [vmem:[%s5462_s28 + $0x60] sm:$0xff]  ;;  %v664_v3 = vld [vmem:[%s5462_s28 + $0x178] sm:$0xff]  ;;  %v667_v4 = vld [vmem:[%s5462_s28 + $0x190] sm:$0xff] }
 0x121   :  { %509 = vmatpush.msra.mxu2 %v206_v1  ;;  %529 = vmatpush.msrb.mxu3 %v210_v2  ;;  %v672_v1 = vld [vmem:[%s5462_s28 + $0x1b8] sm:$0xff]  ;;  %v671_v5 = vld [vmem:[%s5462_s28 + $0x1b0] sm:$0xff] }
 0x122   :  { %v4045_v10 = vadd.f32 %v160_v6, %v157_v9  ;;  %v660_v2 = vld [vmem:[%s5462_s28 + $0x158] sm:$0xff]  ;;  %v659_v6 = vld [vmem:[%s5462_s28 + $0x150] sm:$0xff]  ;;  %v670_v9 = vld [vmem:[%s5462_s28 + $0x1a8] sm:$0xff] }
 0x123   :  { %510 = vmatpush.msra.mxu2 %v205_v7  ;;  %530 = vmatpush.msrb.mxu3 %v209_v8  ;;  %v663_v7 = vld [vmem:[%s5462_s28 + $0x170] sm:$0xff]  ;;  %v666_v8 = vld [vmem:[%s5462_s28 + $0x188] sm:$0xff] }
 0x124   :  { %3421 = vmatmul.msk.f32.vlgmr.msra.gmra.mxu0 %vm129_vm2, %v4045_v10  ;;  %3422 = vmatmul.msk.f32.vlgmr.msra.gmra.mxu1 %vm129_vm2, %v4045_v10 }
 0x125   :  { %511 = vmatpush.msra.mxu2 %v204_v11  ;;  %531 = vmatpush.msrb.mxu3 %v208_v12  ;;  %v658_v11 = vld [vmem:[%s5462_s28 + $0x148] sm:$0xff] }
 0x126   :  { %3419 = vmatmul.msk.f32.vlgmr.msrb.gmra.mxu2 %vm129_vm2, %v3968_v50  ;;  %3420 = vmatmul.msk.f32.vlgmr.msra.gmra.mxu3 %vm129_vm2, %v3968_v50  ;;  %v662_v12 = vld [vmem:[%s5462_s28 + $0x168] sm:$0xff] }
 0x127   :  { %512 = vmatpush.msra.mxu2 %v203_v13  ;;  %532 = vmatpush.msrb.mxu3 %v207_v14  ;;  %v665_v13 = vld [vmem:[%s5462_s28 + $0x180] sm:$0xff] }
 0x128   :  { %757 = vmatpush.msra.mxu0 %v620_v15  ;;  %777 = vmatpush.msra.mxu1 %v624_v16  ;;  %v669_v14 = vld [vmem:[%s5462_s28 + $0x1a0] sm:$0xff] }
 0x129   :  { %589 = vmatpush.msrb.mxu2 %v222_v17  ;;  %609 = vmatpush.msra.mxu3 %v226_v18  ;;  %v657_v15 = vld [vmem:[%s5462_s28 + $0x140] sm:$0xff]  ;;  %v1068_v17 = vld [vmem:[%s5425_s10 + $0x18] sm:$0xff] }
 0x12a   :  { %758 = vmatpush.msra.mxu0 %v619_v19  ;;  %778 = vmatpush.msra.mxu1 %v623_v20  ;;  %v661_v16 = vld [vmem:[%s5462_s28 + $0x160] sm:$0xff]  ;;  %v1072_v18 = vld [vmem:[%s5425_s10 + $0x38] sm:$0xff] }
 0x12b   :  { %590 = vmatpush.msrb.mxu2 %v221_v21  ;;  %610 = vmatpush.msra.mxu3 %v225_v22  ;;  %v676_v19 = vld [vmem:[%s5462_s28 + $0x1d8] sm:$0xff]  ;;  %v1067_v21 = vld [vmem:[%s5425_s10 + $0x10] sm:$0xff] }
 0x12c   :  { %3425 = vmatmul.msk.f32.vlgmr.msrb.gmra.mxu0 %vm129_vm2, %v4045_v10  ;;  %3426 = vmatmul.msk.f32.vlgmr.msrb.gmra.mxu1 %vm129_vm2, %v4045_v10  ;;  %v680_v20 = vld [vmem:[%s5462_s28 + $0x1f8] sm:$0xff]  ;;  %v1071_v22 = vld [vmem:[%s5425_s10 + $0x30] sm:$0xff] }
 0x12d   :  { %759 = vmatpush.msra.mxu0 %v618_v23  ;;  %779 = vmatpush.msra.mxu1 %v622_v24  ;;  %v675_v23 = vld [vmem:[%s5462_s28 + $0x1d0] sm:$0xff] }
 0x12e   :  { %3423 = vmatmul.msk.f32.vlgmr.msra.gmra.mxu2 %vm129_vm2, %v4045_v10  ;;  %3424 = vmatmul.msk.f32.vlgmr.msrb.gmra.mxu3 %vm129_vm2, %v4045_v10  ;;  %v679_v24 = vld [vmem:[%s5462_s28 + $0x1f0] sm:$0xff] }
 0x12f   :  { %591 = vmatpush.msrb.mxu2 %v220_v25  ;;  %611 = vmatpush.msra.mxu3 %v224_v26  ;;  %v1066_v25 = vld [vmem:[%s5425_s10 + $0x8] sm:$0xff] }
 0x130   :  { %760 = vmatpush.msra.mxu0 %v617_v27  ;;  %780 = vmatpush.msra.mxu1 %v621_v28  ;;  %v1070_v26 = vld [vmem:[%s5425_s10 + $0x28] sm:$0xff] }
 0x131   :  { %592 = vmatpush.msrb.mxu2 %v219_v29  ;;  %612 = vmatpush.msra.mxu3 %v223_v30  ;;  %v674_v27 = vld [vmem:[%s5462_s28 + $0x1c8] sm:$0xff]  ;;  %v1065_v29 = vld [vmem:[%s5425_s10] sm:$0xff] }
 0x132   :  { %837 = vmatpush.msrb.mxu0 %v636_v31  ;;  %857 = vmatpush.msrb.mxu1 %v640_v32  ;;  %v678_v28 = vld [vmem:[%s5462_s28 + $0x1e8] sm:$0xff]  ;;  %v1069_v30 = vld [vmem:[%s5425_s10 + $0x20] sm:$0xff] }
 0x133   :  { %797 = vmatpush.msra.mxu2 %v628_v33  ;;  %817 = vmatpush.msrb.mxu3 %v632_v34  ;;  %v673_v31 = vld [vmem:[%s5462_s28 + $0x1c0] sm:$0xff]  ;;  %v1084_v33 = vld [vmem:[%s5425_s10 + $0x98] sm:$0xff] }
 0x134   :  { %3429 = vmatmul.msk.f32.vlgmr.msra.gmra.mxu0 %vm129_vm2, %v3968_v50  ;;  %3430 = vmatmul.msk.f32.vlgmr.msra.gmra.mxu1 %vm129_vm2, %v3968_v50  ;;  %v677_v32 = vld [vmem:[%s5462_s28 + $0x1e0] sm:$0xff]  ;;  %v1088_v34 = vld [vmem:[%s5425_s10 + $0xb8] sm:$0xff] }
 0x135   :  { %838 = vmatpush.msrb.mxu0 %v635_v35  ;;  %858 = vmatpush.msrb.mxu1 %v639_v36  ;;  %v1076_v35 = vld [vmem:[%s5425_s10 + $0x58] sm:$0xff] }
 0x136   :  { %3427 = vmatmul.msk.f32.vlgmr.msrb.gmra.mxu2 %vm129_vm2, %v4045_v10  ;;  %3428 = vmatmul.msk.f32.vlgmr.msra.gmra.mxu3 %vm129_vm2, %v4045_v10  ;;  %v1080_v36 = vld [vmem:[%s5425_s10 + $0x78] sm:$0xff] }
 0x137   :  { %798 = vmatpush.msra.mxu2 %v627_v37  ;;  %818 = vmatpush.msrb.mxu3 %v631_v38  ;;  %v1083_v37 = vld [vmem:[%s5425_s10 + $0x90] sm:$0xff] }
 0x138   :  { %839 = vmatpush.msrb.mxu0 %v634_v39  ;;  %859 = vmatpush.msrb.mxu1 %v638_v40  ;;  %v1087_v38 = vld [vmem:[%s5425_s10 + $0xb0] sm:$0xff] }
 0x139   :  { %799 = vmatpush.msra.mxu2 %v626_v41  ;;  %819 = vmatpush.msrb.mxu3 %v630_v42  ;;  %v1075_v39 = vld [vmem:[%s5425_s10 + $0x50] sm:$0xff]  ;;  %v1082_v41 = vld [vmem:[%s5425_s10 + $0x88] sm:$0xff] }
 0x13a   :  { %840 = vmatpush.msrb.mxu0 %v633_v43  ;;  %860 = vmatpush.msrb.mxu1 %v637_v44  ;;  %v1079_v40 = vld [vmem:[%s5425_s10 + $0x70] sm:$0xff]  ;;  %v1086_v42 = vld [vmem:[%s5425_s10 + $0xa8] sm:$0xff] }
 0x13b   :  { %800 = vmatpush.msra.mxu2 %v625_v45  ;;  %820 = vmatpush.msrb.mxu3 %v629_v46  ;;  %v1074_v43 = vld [vmem:[%s5425_s10 + $0x48] sm:$0xff]  ;;  %v1081_v45 = vld [vmem:[%s5425_s10 + $0x80] sm:$0xff] }
 0x13c   :  { %3433 = vmatmul.msk.f32.vlgmr.msrb.gmra.mxu0 %vm129_vm2, %v3968_v50  ;;  %3434 = vmatmul.msk.f32.vlgmr.msrb.gmra.mxu1 %vm129_vm2, %v3968_v50  ;;  %v1078_v44 = vld [vmem:[%s5425_s10 + $0x68] sm:$0xff]  ;;  %v1085_v46 = vld [vmem:[%s5425_s10 + $0xa0] sm:$0xff] }
 0x13d   :  { %917 = vmatpush.msra.mxu0 %v652_v47  ;;  %937 = vmatpush.msra.mxu1 %v656_v48  ;;  %v1073_v47 = vld [vmem:[%s5425_s10 + $0x40] sm:$0xff] }
 0x13e   :  { %3431 = vmatmul.msk.f32.vlgmr.msra.gmra.mxu2 %vm129_vm2, %v3968_v50  ;;  %3432 = vmatmul.msk.f32.vlgmr.msrb.gmra.mxu3 %vm129_vm2, %v3968_v50  ;;  %v1077_v48 = vld [vmem:[%s5425_s10 + $0x60] sm:$0xff] }
 0x13f   :  { %877 = vmatpush.msrb.mxu2 %v644_v49  ;;  %897 = vmatpush.msra.mxu3 %v648_v51  ;;  %v1100_v49 = vld [vmem:[%s5425_s10 + $0x118] sm:$0xff] }
 0x140   :  { %918 = vmatpush.msra.mxu0 %v651_v52  ;;  %938 = vmatpush.msra.mxu1 %v655_v53  ;;  %v1104_v51 = vld [vmem:[%s5425_s10 + $0x138] sm:$0xff] }
 0x141   :  { %878 = vmatpush.msrb.mxu2 %v643_v54  ;;  %898 = vmatpush.msra.mxu3 %v647_v55  ;;  %v1092_v52 = vld [vmem:[%s5425_s10 + $0xd8] sm:$0xff]  ;;  %v1099_v54 = vld [vmem:[%s5425_s10 + $0x110] sm:$0xff] }
 0x142   :  { %919 = vmatpush.msra.mxu0 %v650_v56  ;;  %939 = vmatpush.msra.mxu1 %v654_v57  ;;  %v1096_v53 = vld [vmem:[%s5425_s10 + $0xf8] sm:$0xff]  ;;  %v1103_v55 = vld [vmem:[%s5425_s10 + $0x130] sm:$0xff] }
 0x143   :  { %879 = vmatpush.msrb.mxu2 %v642_v58  ;;  %899 = vmatpush.msra.mxu3 %v646_v59  ;;  %v1091_v56 = vld [vmem:[%s5425_s10 + $0xd0] sm:$0xff]  ;;  %v1098_v58 = vld [vmem:[%s5425_s10 + $0x108] sm:$0xff] }
 0x144   :  { %920 = vmatpush.msra.mxu0 %v649_v60  ;;  %940 = vmatpush.msra.mxu1 %v653_v61  ;;  %v1095_v57 = vld [vmem:[%s5425_s10 + $0xf0] sm:$0xff]  ;;  %v1102_v59 = vld [vmem:[%s5425_s10 + $0x128] sm:$0xff] }
 0x145   :  { %3437 = vmatmul.msk.f32.vlgmr.msra.gmra.mxu0 %vm129_vm2, %v4045_v10  ;;  %3438 = vmatmul.msk.f32.vlgmr.msra.gmra.mxu1 %vm129_vm2, %v4045_v10  ;;  %v1090_v60 = vld [vmem:[%s5425_s10 + $0xc8] sm:$0xff] }
 0x146   :  { %880 = vmatpush.msrb.mxu2 %v641_v62  ;;  %900 = vmatpush.msra.mxu3 %v645_v63  ;;  %v1094_v61 = vld [vmem:[%s5425_s10 + $0xe8] sm:$0xff]  ;;  %v1097_v62 = vld [vmem:[%s5425_s10 + $0x100] sm:$0xff] }
 0x147   :  { %997 = vmatpush.msrb.mxu0 %v668_v0  ;;  %1017 = vmatpush.msrb.mxu1 %v672_v1  ;;  %v1101_v63 = vld [vmem:[%s5425_s10 + $0x120] sm:$0xff] }
 0x148   :  { %3435 = vmatmul.msk.f32.vlgmr.msrb.gmra.mxu2 %vm129_vm2, %v3968_v50  ;;  %3436 = vmatmul.msk.f32.vlgmr.msra.gmra.mxu3 %vm129_vm2, %v3968_v50  ;;  %v1089_v0 = vld [vmem:[%s5425_s10 + $0xc0] sm:$0xff] }
 0x149   :  { %957 = vmatpush.msra.mxu2 %v660_v2  ;;  %977 = vmatpush.msrb.mxu3 %v664_v3  ;;  %v1093_v1 = vld [vmem:[%s5425_s10 + $0xe0] sm:$0xff]  ;;  %v1116_v2 = vld [vmem:[%s5425_s10 + $0x198] sm:$0xff] }
 0x14a   :  { %998 = vmatpush.msrb.mxu0 %v667_v4  ;;  %1018 = vmatpush.msrb.mxu1 %v671_v5  ;;  %v1120_v3 = vld [vmem:[%s5425_s10 + $0x1b8] sm:$0xff] }
 0x14b   :  { %958 = vmatpush.msra.mxu2 %v659_v6  ;;  %978 = vmatpush.msrb.mxu3 %v663_v7  ;;  %v1108_v4 = vld [vmem:[%s5425_s10 + $0x158] sm:$0xff]  ;;  %v1115_v6 = vld [vmem:[%s5425_s10 + $0x190] sm:$0xff] }
 0x14c   :  { %999 = vmatpush.msrb.mxu0 %v666_v8  ;;  %1019 = vmatpush.msrb.mxu1 %v670_v9  ;;  %v1112_v5 = vld [vmem:[%s5425_s10 + $0x178] sm:$0xff]  ;;  %v1119_v7 = vld [vmem:[%s5425_s10 + $0x1b0] sm:$0xff] }
 0x14d   :  { %959 = vmatpush.msra.mxu2 %v658_v11  ;;  %979 = vmatpush.msrb.mxu3 %v662_v12  ;;  %v1107_v8 = vld [vmem:[%s5425_s10 + $0x150] sm:$0xff]  ;;  %v1114_v11 = vld [vmem:[%s5425_s10 + $0x188] sm:$0xff] }
 0x14e   :  { %1000 = vmatpush.msrb.mxu0 %v665_v13  ;;  %1020 = vmatpush.msrb.mxu1 %v669_v14  ;;  %v1111_v9 = vld [vmem:[%s5425_s10 + $0x170] sm:$0xff]  ;;  %v1118_v12 = vld [vmem:[%s5425_s10 + $0x1a8] sm:$0xff] }
 0x14f   :  { %3441 = vmatmul.msk.f32.vlgmr.msrb.gmra.mxu0 %vm129_vm2, %v4045_v10  ;;  %3442 = vmatmul.msk.f32.vlgmr.msrb.gmra.mxu1 %vm129_vm2, %v4045_v10  ;;  %v1106_v13 = vld [vmem:[%s5425_s10 + $0x148] sm:$0xff] }
 0x150   :  { %960 = vmatpush.msra.mxu2 %v657_v15  ;;  %980 = vmatpush.msrb.mxu3 %v661_v16  ;;  %v1110_v14 = vld [vmem:[%s5425_s10 + $0x168] sm:$0xff]  ;;  %v1113_v15 = vld [vmem:[%s5425_s10 + $0x180] sm:$0xff] }
 0x151   :  { %1205 = vmatpush.msra.mxu0 %v1068_v17  ;;  %1225 = vmatpush.msra.mxu1 %v1072_v18  ;;  %v1117_v16 = vld [vmem:[%s5425_s10 + $0x1a0] sm:$0xff] }
 0x152   :  { %3439 = vmatmul.msk.f32.vlgmr.msra.gmra.mxu2 %vm129_vm2, %v4045_v10  ;;  %3440 = vmatmul.msk.f32.vlgmr.msrb.gmra.mxu3 %vm129_vm2, %v4045_v10  ;;  %v1105_v17 = vld [vmem:[%s5425_s10 + $0x140] sm:$0xff] }
 0x153   :  { %1037 = vmatpush.msrb.mxu2 %v676_v19  ;;  %1057 = vmatpush.msra.mxu3 %v680_v20  ;;  %v1109_v18 = vld [vmem:[%s5425_s10 + $0x160] sm:$0xff]  ;;  %v1124_v19 = vld [vmem:[%s5425_s10 + $0x1d8] sm:$0xff] }
 0x154   :  { %1206 = vmatpush.msra.mxu0 %v1067_v21  ;;  %1226 = vmatpush.msra.mxu1 %v1071_v22  ;;  %v1128_v20 = vld [vmem:[%s5425_s10 + $0x1f8] sm:$0xff]  ;;  %v1123_v21 = vld [vmem:[%s5425_s10 + $0x1d0] sm:$0xff] }
 0x155   :  { %1038 = vmatpush.msrb.mxu2 %v675_v23  ;;  %1058 = vmatpush.msra.mxu3 %v679_v24  ;;  %v1127_v22 = vld [vmem:[%s5425_s10 + $0x1f0] sm:$0xff]  ;;  %v1122_v23 = vld [vmem:[%s5425_s10 + $0x1c8] sm:$0xff] }
 0x156   :  { %1207 = vmatpush.msra.mxu0 %v1066_v25  ;;  %1227 = vmatpush.msra.mxu1 %v1070_v26  ;;  %v1126_v24 = vld [vmem:[%s5425_s10 + $0x1e8] sm:$0xff]  ;;  %v1121_v25 = vld [vmem:[%s5425_s10 + $0x1c0] sm:$0xff] }
 0x157   :  { %1039 = vmatpush.msrb.mxu2 %v674_v27  ;;  %1059 = vmatpush.msra.mxu3 %v678_v28  ;;  %v1125_v26 = vld [vmem:[%s5425_s10 + $0x1e0] sm:$0xff] }
 0x158   :  { %1208 = vmatpush.msra.mxu0 %v1065_v29  ;;  %1228 = vmatpush.msra.mxu1 %v1069_v30 }
 0x159   :  { %3445 = vmatmul.msk.f32.vlgmr.msra.gmra.mxu0 %vm129_vm2, %v3968_v50  ;;  %3446 = vmatmul.msk.f32.vlgmr.msra.gmra.mxu1 %vm129_vm2, %v3968_v50 }
 0x15a   :  { %1040 = vmatpush.msrb.mxu2 %v673_v31  ;;  %1060 = vmatpush.msra.mxu3 %v677_v32 }
 0x15b   :  { %1285 = vmatpush.msrb.mxu0 %v1084_v33  ;;  %1305 = vmatpush.msrb.mxu1 %v1088_v34 }
 0x15c   :  { %3443 = vmatmul.msk.f32.vlgmr.msrb.gmra.mxu2 %vm129_vm2, %v4045_v10  ;;  %3444 = vmatmul.msk.f32.vlgmr.msra.gmra.mxu3 %vm129_vm2, %v4045_v10 }
 0x15d   :  { %1245 = vmatpush.msra.mxu2 %v1076_v35  ;;  %1265 = vmatpush.msrb.mxu3 %v1080_v36 }
 0x15e   :  { %1286 = vmatpush.msrb.mxu0 %v1083_v37  ;;  %1306 = vmatpush.msrb.mxu1 %v1087_v38 }
 0x15f   :  { %1246 = vmatpush.msra.mxu2 %v1075_v39  ;;  %1266 = vmatpush.msrb.mxu3 %v1079_v40  ;;  %v3569_v39 = vld [vmem:[%s5424_s9] ss:$0 sm:$0xff]  ;;  %v3570_v40 = vld [vmem:[%s5424_s9 + $0x1] ss:$0 sm:$0xff] }
 0x160   :  { %1287 = vmatpush.msrb.mxu0 %v1082_v41  ;;  %1307 = vmatpush.msrb.mxu1 %v1086_v42 }
 0x161   :  { %1247 = vmatpush.msra.mxu2 %v1074_v43  ;;  %1267 = vmatpush.msrb.mxu3 %v1078_v44  ;;  %v3557_v43 = vld [vmem:[%s5463_s2] ss:$0 sm:$0xff]  ;;  %v3558_v44 = vld [vmem:[%s5463_s2 + $0x1] ss:$0 sm:$0xff] }
 0x162   :  { %1288 = vmatpush.msrb.mxu0 %v1081_v45  ;;  %1308 = vmatpush.msrb.mxu1 %v1085_v46 }
 0x163   :  { %3449 = vmatmul.msk.f32.vlgmr.msrb.gmra.mxu0 %vm129_vm2, %v3968_v50  ;;  %3450 = vmatmul.msk.f32.vlgmr.msrb.gmra.mxu1 %vm129_vm2, %v3968_v50 }
 0x164   :  { %1248 = vmatpush.msra.mxu2 %v1073_v47  ;;  %1268 = vmatpush.msrb.mxu3 %v1077_v48 }
 0x165   :  { %1365 = vmatpush.msra.mxu0 %v1100_v49  ;;  %1385 = vmatpush.msra.mxu1 %v1104_v51 }
 0x166   :  { %3447 = vmatmul.msk.f32.vlgmr.msra.gmra.mxu2 %vm129_vm2, %v3968_v50  ;;  %3448 = vmatmul.msk.f32.vlgmr.msrb.gmra.mxu3 %vm129_vm2, %v3968_v50 }
 0x167   :  { %1325 = vmatpush.msrb.mxu2 %v1092_v52  ;;  %1345 = vmatpush.msra.mxu3 %v1096_v53  ;;  %v3573_v52 = vld [vmem:[%s5424_s9 + $0x4] ss:$0 sm:$0xff]  ;;  %v3574_v53 = vld [vmem:[%s5424_s9 + $0x5] ss:$0 sm:$0xff] }
 0x168   :  { %1366 = vmatpush.msra.mxu0 %v1099_v54  ;;  %1386 = vmatpush.msra.mxu1 %v1103_v55 }
 0x169   :  { %1326 = vmatpush.msrb.mxu2 %v1091_v56  ;;  %1346 = vmatpush.msra.mxu3 %v1095_v57  ;;  %v3555_v56 = vld [vmem:[%s5463_s2 + $0x4] ss:$0 sm:$0xff]  ;;  %v3556_v57 = vld [vmem:[%s5463_s2 + $0x5] ss:$0 sm:$0xff] }
 0x16a   :  { %1367 = vmatpush.msra.mxu0 %v1098_v58  ;;  %1387 = vmatpush.msra.mxu1 %v1102_v59 }
 0x16b   :  { %1327 = vmatpush.msrb.mxu2 %v1090_v60  ;;  %1347 = vmatpush.msra.mxu3 %v1094_v61 }
 0x16c   :  { %1368 = vmatpush.msra.mxu0 %v1097_v62  ;;  %1388 = vmatpush.msra.mxu1 %v1101_v63 }
 0x16d   :  { %3453 = vmatmul.msk.f32.vlgmr.msra.gmra.mxu0 %vm129_vm2, %v4045_v10  ;;  %3454 = vmatmul.msk.f32.vlgmr.msra.gmra.mxu1 %vm129_vm2, %v4045_v10 }
 0x16e   :  { %1328 = vmatpush.msrb.mxu2 %v1089_v0  ;;  %1348 = vmatpush.msra.mxu3 %v1093_v1  ;;  %v3575_v0 = vld [vmem:[%s5424_s9 + $0x2] ss:$0 sm:$0xff]  ;;  %v3576_v1 = vld [vmem:[%s5424_s9 + $0x3] ss:$0 sm:$0xff] }
 0x16f   :  { %1445 = vmatpush.msrb.mxu0 %v1116_v2  ;;  %1465 = vmatpush.msrb.mxu1 %v1120_v3  ;;  %v3577_v2 = vld [vmem:[%s5424_s9 + $0x8] ss:$0 sm:$0xff]  ;;  %v3578_v3 = vld [vmem:[%s5424_s9 + $0x9] ss:$0 sm:$0xff] }
 0x170   :  { %3451 = vmatmul.msk.f32.vlgmr.msrb.gmra.mxu2 %vm129_vm2, %v3968_v50  ;;  %3452 = vmatmul.msk.f32.vlgmr.msra.gmra.mxu3 %vm129_vm2, %v3968_v50 }
 0x171   :  { %1405 = vmatpush.msra.mxu2 %v1108_v4  ;;  %1425 = vmatpush.msrb.mxu3 %v1112_v5  ;;  %v3559_v4 = vld [vmem:[%s5463_s2 + $0x2] ss:$0 sm:$0xff]  ;;  %v3560_v5 = vld [vmem:[%s5463_s2 + $0x3] ss:$0 sm:$0xff] }
 0x172   :  { %1446 = vmatpush.msrb.mxu0 %v1115_v6  ;;  %1466 = vmatpush.msrb.mxu1 %v1119_v7 }
 0x173   :  { %1406 = vmatpush.msra.mxu2 %v1107_v8  ;;  %1426 = vmatpush.msrb.mxu3 %v1111_v9  ;;  %v3561_v8 = vld [vmem:[%s5463_s2 + $0x8] ss:$0 sm:$0xff]  ;;  %v3562_v9 = vld [vmem:[%s5463_s2 + $0x9] ss:$0 sm:$0xff] }
 0x174   :  { %1447 = vmatpush.msrb.mxu0 %v1114_v11  ;;  %1467 = vmatpush.msrb.mxu1 %v1118_v12 }
 0x175   :  { %1407 = vmatpush.msra.mxu2 %v1106_v13  ;;  %1427 = vmatpush.msrb.mxu3 %v1110_v14 }
 0x176   :  { %1448 = vmatpush.msrb.mxu0 %v1113_v15  ;;  %1468 = vmatpush.msrb.mxu1 %v1117_v16 }
 0x177   :  { %3457 = vmatmul.msk.f32.vlgmr.msrb.gmra.mxu0 %vm129_vm2, %v4045_v10  ;;  %3458 = vmatmul.msk.f32.vlgmr.msrb.gmra.mxu1 %vm129_vm2, %v4045_v10 }
 0x178   :  { %1408 = vmatpush.msra.mxu2 %v1105_v17  ;;  %1428 = vmatpush.msrb.mxu3 %v1109_v18 }
 0x179   :  { %3455 = vmatmul.msk.f32.vlgmr.msra.gmra.mxu2 %vm129_vm2, %v4045_v10  ;;  %3456 = vmatmul.msk.f32.vlgmr.msrb.gmra.mxu3 %vm129_vm2, %v4045_v10 }
 0x17a   :  { %1485 = vmatpush.msrb.mxu2 %v1124_v19  ;;  %1505 = vmatpush.msra.mxu3 %v1128_v20 }
 0x17c   :  { %1486 = vmatpush.msrb.mxu2 %v1123_v21  ;;  %1506 = vmatpush.msra.mxu3 %v1127_v22  ;;  %v3579_v21 = vld [vmem:[%s5424_s9 + $0x6] ss:$0 sm:$0xff]  ;;  %v3580_v22 = vld [vmem:[%s5424_s9 + $0x7] ss:$0 sm:$0xff] }
 0x17e   :  { %1487 = vmatpush.msrb.mxu2 %v1122_v23  ;;  %1507 = vmatpush.msra.mxu3 %v1126_v24  ;;  %v3581_v23 = vld [vmem:[%s5424_s9 + $0xc] ss:$0 sm:$0xff]  ;;  %v3582_v24 = vld [vmem:[%s5424_s9 + $0xd] ss:$0 sm:$0xff] }
 0x180   :  { %1488 = vmatpush.msrb.mxu2 %v1121_v25  ;;  %1508 = vmatpush.msra.mxu3 %v1125_v26  ;;  %v3563_v25 = vld [vmem:[%s5463_s2 + $0x6] ss:$0 sm:$0xff]  ;;  %v3564_v26 = vld [vmem:[%s5463_s2 + $0x7] ss:$0 sm:$0xff] }
 0x181   :  { %3459 = vmatmul.msk.f32.vlgmr.msrb.gmra.mxu2 %vm129_vm2, %v4045_v10  ;;  %3460 = vmatmul.msk.f32.vlgmr.msra.gmra.mxu3 %vm129_vm2, %v4045_v10 }
 0x194   :  { %v391_v29 = vpop.f32.mrf.mxu0  ;;  %v411_v30 = vpop.f32.mrf.mxu1 }
 0x195   :  { %v392_v62 = vadd.f32 %v3555_v56, %v391_v29  ;;  %v412_v63 = vadd.f32 %v3556_v57, %v411_v30  ;;  %v3565_v29 = vld [vmem:[%s5463_s2 + $0xc] ss:$0 sm:$0xff]  ;;  %v3566_v30 = vld [vmem:[%s5463_s2 + $0xd] ss:$0 sm:$0xff] }
 0x199   :  { %v311_v27 = vpop.f32.mrf.mxu2  ;;  %v331_v28 = vpop.f32.mrf.mxu3 }
 0x19a   :  { %v312_v49 = vadd.f32 %v3557_v43, %v311_v27  ;;  %v332_v51 = vadd.f32 %v3558_v44, %v331_v28 }
 0x1a1   :  { %v351_v31 = vpop.f32.mrf.mxu2  ;;  %v371_v32 = vpop.f32.mrf.mxu3 }
 0x1a2   :  { %v474_v33 = vpop.f32.mrf.mxu0  ;;  %v494_v34 = vpop.f32.mrf.mxu1  ;;  %v352_v17 = vadd.f32 %v3559_v4, %v351_v31  ;;  %v372_v18 = vadd.f32 %v3560_v5, %v371_v32 }
 0x1a3   :  { %v475_v19 = vadd.f32 %v3561_v8, %v474_v33  ;;  %v495_v20 = vadd.f32 %v3562_v9, %v494_v34 }
 0x1a9   :  { %v4551_v35 = vpop.f32.mrf.mxu2  ;;  %v4553_v36 = vpop.f32.mrf.mxu3 }
 0x1aa   :  { %v4555_v37 = vpop.f32.mrf.mxu0  ;;  %v4557_v38 = vpop.f32.mrf.mxu1  ;;  %v432_v43 = vadd.f32 %v3563_v25, %v4551_v35  ;;  %v452_v44 = vadd.f32 %v3564_v26, %v4553_v36  ;;  %v3583_v35 = vld [vmem:[%s5424_s9 + $0xa] ss:$0 sm:$0xff]  ;;  %v3584_v36 = vld [vmem:[%s5424_s9 + $0xb] ss:$0 sm:$0xff] }
 0x1b1   :  { %v4565_v41 = vpop.f32.mrf.mxu2  ;;  %v4567_v42 = vpop.f32.mrf.mxu3 }
 0x1b2   :  { %v762_v45 = vpop.f32.mrf.mxu0  ;;  %v782_v46 = vpop.f32.mrf.mxu1 }
 0x1b3   :  { %v763_v47 = vadd.f32 %v3569_v39, %v762_v45  ;;  %v783_v48 = vadd.f32 %v3570_v40, %v782_v46  ;;  %v555_v45 = vadd.f32 %v3565_v29, %v4555_v37  ;;  %v575_v46 = vadd.f32 %v3566_v30, %v4557_v38  ;;  %v3585_v37 = vld [vmem:[%s5426_s11] ss:$0 sm:$0xff]  ;;  %v3586_v38 = vld [vmem:[%s5426_s11 + $0x1] ss:$0 sm:$0xff] }
 0x1b5   :  { %3461 = vmatpush.xpose.msk.msra.mxu0 %vm85_vm1, %v763_v47  ;;  %3463 = vmatpush.xpose.msk.msra.mxu1 %vm85_vm1, %v783_v48  ;;  %v3567_v47 = vld [vmem:[%s5463_s2 + $0xa] ss:$0 sm:$0xff]  ;;  %v3568_v48 = vld [vmem:[%s5463_s2 + $0xb] ss:$0 sm:$0xff] }
 0x1b8   :  { %3462 = vmatmul.msk.f32.vlgmr.msra.gmra.mxu0 %vm85_vm1, %v312_v49  ;;  %3464 = vmatmul.msk.f32.vlgmr.msra.gmra.mxu1 %vm85_vm1, %v332_v51 }
 0x1b9   :  { %v4585_v54 = vpop.f32.mrf.mxu2  ;;  %v4587_v55 = vpop.f32.mrf.mxu3 }
 0x1ba   :  { %v842_v58 = vpop.f32.mrf.mxu0  ;;  %v862_v59 = vpop.f32.mrf.mxu1 }
 0x1bb   :  { %v843_v60 = vadd.f32 %v3573_v52, %v842_v58  ;;  %v863_v61 = vadd.f32 %v3574_v53, %v862_v59 }
 0x1bd   :  { %3469 = vmatpush.xpose.msk.msrb.mxu0 %vm85_vm1, %v843_v60  ;;  %3471 = vmatpush.xpose.msk.msrb.mxu1 %vm85_vm1, %v863_v61  ;;  %v515_v60 = vadd.f32 %v3567_v47, %v4565_v41  ;;  %v535_v61 = vadd.f32 %v3568_v48, %v4567_v42  ;;  %v3589_v41 = vld [vmem:[%s5426_s11 + $0x4] ss:$0 sm:$0xff]  ;;  %v3590_v42 = vld [vmem:[%s5426_s11 + $0x5] ss:$0 sm:$0xff] }
 0x1c0   :  { %3470 = vmatmul.msk.f32.vlgmr.msrb.gmra.mxu0 %vm85_vm1, %v392_v62  ;;  %3472 = vmatmul.msk.f32.vlgmr.msrb.gmra.mxu1 %vm85_vm1, %v412_v63  ;;  %v3587_v62 = vld [vmem:[%s5424_s9 + $0xe] ss:$0 sm:$0xff]  ;;  %v3588_v63 = vld [vmem:[%s5424_s9 + $0xf] ss:$0 sm:$0xff] }
 0x1c1   :  { %v802_v6 = vpop.f32.mrf.mxu2  ;;  %v822_v7 = vpop.f32.mrf.mxu3 }
 0x1c2   :  { %v803_v11 = vadd.f32 %v3575_v0, %v802_v6  ;;  %v823_v12 = vadd.f32 %v3576_v1, %v822_v7  ;;  %v922_v13 = vpop.f32.mrf.mxu0  ;;  %v942_v14 = vpop.f32.mrf.mxu1  ;;  %v3571_v0 = vld [vmem:[%s5463_s2 + $0xe] ss:$0 sm:$0xff]  ;;  %v3572_v1 = vld [vmem:[%s5463_s2 + $0xf] ss:$0 sm:$0xff] }
 0x1c3   :  { %v923_v15 = vadd.f32 %v3577_v2, %v922_v13  ;;  %v943_v16 = vadd.f32 %v3578_v3, %v942_v14  ;;  %v3591_v13 = vld [vmem:[%s5426_s11 + $0x2] ss:$0 sm:$0xff]  ;;  %v3592_v14 = vld [vmem:[%s5426_s11 + $0x3] ss:$0 sm:$0xff] }
 0x1c4   :  { %3465 = vmatpush.xpose.msk.msra.mxu2 %vm85_vm1, %v803_v11  ;;  %3467 = vmatpush.xpose.msk.msrb.mxu3 %vm85_vm1, %v823_v12  ;;  %v595_v11 = vadd.f32 %v3571_v0, %v4585_v54  ;;  %v615_v12 = vadd.f32 %v3572_v1, %v4587_v55  ;;  %v3595_v55 = vld [vmem:[%s5426_s11 + $0x6] ss:$0 sm:$0xff] }
 0x1c5   :  { %3477 = vmatpush.xpose.msk.msra.mxu0 %vm85_vm1, %v923_v15  ;;  %3479 = vmatpush.xpose.msk.msra.mxu1 %vm85_vm1, %v943_v16 }
 0x1c7   :  { %3466 = vmatmul.msk.f32.vlgmr.msra.gmra.mxu2 %vm85_vm1, %v352_v17  ;;  %3468 = vmatmul.msk.f32.vlgmr.msrb.gmra.mxu3 %vm85_vm1, %v372_v18  ;;  %v3596_v18 = vld [vmem:[%s5426_s11 + $0x7] ss:$0 sm:$0xff] }
 0x1c8   :  { %3478 = vmatmul.msk.f32.vlgmr.msra.gmra.mxu0 %vm85_vm1, %v475_v19  ;;  %3480 = vmatmul.msk.f32.vlgmr.msra.gmra.mxu1 %vm85_vm1, %v495_v20 }
 0x1cb   :  { %v882_v27 = vpop.f32.mrf.mxu2  ;;  %v902_v28 = vpop.f32.mrf.mxu3 }
 0x1cc   :  { %v883_v31 = vadd.f32 %v3579_v21, %v882_v27  ;;  %v903_v32 = vadd.f32 %v3580_v22, %v902_v28  ;;  %v1002_v33 = vpop.f32.mrf.mxu0  ;;  %v1022_v34 = vpop.f32.mrf.mxu1 }
 0x1cd   :  { %v1003_v39 = vadd.f32 %v3581_v23, %v1002_v33  ;;  %v1023_v40 = vadd.f32 %v3582_v24, %v1022_v34 }
 0x1ce   :  { %3473 = vmatpush.xpose.msk.msrb.mxu2 %vm85_vm1, %v883_v31  ;;  %3475 = vmatpush.xpose.msk.msra.mxu3 %vm85_vm1, %v903_v32 }
 0x1cf   :  { %3485 = vmatpush.xpose.msk.msrb.mxu0 %vm85_vm1, %v1003_v39  ;;  %3487 = vmatpush.xpose.msk.msrb.mxu1 %vm85_vm1, %v1023_v40 }
 0x1d1   :  { %3474 = vmatmul.msk.f32.vlgmr.msrb.gmra.mxu2 %vm85_vm1, %v432_v43  ;;  %3476 = vmatmul.msk.f32.vlgmr.msra.gmra.mxu3 %vm85_vm1, %v452_v44 }
 0x1d2   :  { %3486 = vmatmul.msk.f32.vlgmr.msrb.gmra.mxu0 %vm85_vm1, %v555_v45  ;;  %3488 = vmatmul.msk.f32.vlgmr.msrb.gmra.mxu1 %vm85_vm1, %v575_v46 }
 0x1d5   :  { %v962_v49 = vpop.f32.mrf.mxu2  ;;  %v982_v51 = vpop.f32.mrf.mxu3 }
 0x1d6   :  { %v963_v52 = vadd.f32 %v3583_v35, %v962_v49  ;;  %v983_v53 = vadd.f32 %v3584_v36, %v982_v51  ;;  %v1210_v56 = vpop.f32.mrf.mxu0  ;;  %v1230_v57 = vpop.f32.mrf.mxu1 }
 0x1d7   :  { %v1211_v58 = vadd.f32 %v3585_v37, %v1210_v56  ;;  %v1231_v59 = vadd.f32 %v3586_v38, %v1230_v57 }
 0x1d8   :  { %3481 = vmatpush.xpose.msk.msra.mxu2 %vm85_vm1, %v963_v52  ;;  %3483 = vmatpush.xpose.msk.msrb.mxu3 %vm85_vm1, %v983_v53 }
 0x1d9   :  { %2332 = vmatpush.msra.mxu0 %v1211_v58  ;;  %2355 = vmatpush.msra.mxu1 %v1231_v59 }
 0x1db   :  { %3482 = vmatmul.msk.f32.vlgmr.msra.gmra.mxu2 %vm85_vm1, %v515_v60  ;;  %3484 = vmatmul.msk.f32.vlgmr.msrb.gmra.mxu3 %vm85_vm1, %v535_v61 }
 0x1df   :  { %v1042_v2 = vpop.f32.mrf.mxu2  ;;  %v1062_v3 = vpop.f32.mrf.mxu3 }
 0x1e0   :  { %v1043_v4 = vadd.f32 %v3587_v62, %v1042_v2  ;;  %v1063_v5 = vadd.f32 %v3588_v63, %v1062_v3  ;;  %v1290_v6 = vpop.f32.mrf.mxu0  ;;  %v1310_v7 = vpop.f32.mrf.mxu1 }
 0x1e1   :  { %v1291_v8 = vadd.f32 %v3589_v41, %v1290_v6  ;;  %v1311_v9 = vadd.f32 %v3590_v42, %v1310_v7 }
 0x1e2   :  { %3489 = vmatpush.xpose.msk.msrb.mxu2 %vm85_vm1, %v1043_v4  ;;  %3491 = vmatpush.xpose.msk.msra.mxu3 %vm85_vm1, %v1063_v5 }
 0x1e3   :  { %2424 = vmatpush.msrb.mxu0 %v1291_v8  ;;  %2447 = vmatpush.msrb.mxu1 %v1311_v9 }
 0x1e5   :  { %3490 = vmatmul.msk.f32.vlgmr.msrb.gmra.mxu2 %vm85_vm1, %v595_v11  ;;  %3492 = vmatmul.msk.f32.vlgmr.msra.gmra.mxu3 %vm85_vm1, %v615_v12 }
 0x1e9   :  { %v1250_v15 = vpop.f32.mrf.mxu2  ;;  %v1270_v16 = vpop.f32.mrf.mxu3 }
 0x1ea   :  { %v1251_v17 = vadd.f32 %v3591_v13, %v1250_v15  ;;  %v1271_v54 = vadd.f32 %v3592_v14, %v1270_v16  ;;  %v4727_v23 = vpop.f32.mrf.mxu0  ;;  %v4729_v24 = vpop.f32.mrf.mxu1 }
 0x1ec   :  { %2378 = vmatpush.msra.mxu2 %v1251_v17  ;;  %2401 = vmatpush.msrb.mxu3 %v1271_v54 }
 0x1f3   :  { %v1330_v19 = vpop.f32.mrf.mxu2  ;;  %v1350_v20 = vpop.f32.mrf.mxu3 }
 0x1f4   :  { %v1331_v21 = vadd.f32 %v3595_v55, %v1330_v19  ;;  %v1351_v22 = vadd.f32 %v3596_v18, %v1350_v20  ;;  %v4731_v25 = vpop.f32.mrf.mxu0  ;;  %v4733_v26 = vpop.f32.mrf.mxu1 }
 0x1f6   :  { %2470 = vmatpush.msrb.mxu2 %v1331_v21  ;;  %2493 = vmatpush.msra.mxu3 %v1351_v22 }
 0x1fc   :  { %v4737_v31 = vpop.f32.mrf.mxu2  ;;  %v4739_v32 = vpop.f32.mrf.mxu3 }
 0x204   :  { %v4741_v33 = vpop.f32.mrf.mxu2  ;;  %v4743_v34 = vpop.f32.mrf.mxu3 }
 0x235   :  { %v1536_v27 = vpop.f32.mrf.mxu0  ;;  %v1562_v28 = vpop.f32.mrf.mxu1 }
 0x236   :  { %v1933_v29 = vsel %vm1929_vm3, %v1562_v28, -inf  ;;  %v1930_v30 = vsel %vm1929_vm3, %v1536_v27, -inf }
 0x237   :  { %1934 = vmax.xlane.f32.xlu2 %v1933_v29  ;;  %1931 = vmax.xlane.f32.xlu1 %v1930_v30 }
 0x23d   :  { %v4758_v37 = vpop.f32.mrf.mxu0  ;;  %v4760_v38 = vpop.f32.mrf.mxu1 }
 0x23e   :  { %v1942_v47 = vsel %vm1929_vm3, %v4758_v37, -inf  ;;  %v1945_v48 = vsel %vm1929_vm3, %v4760_v38, -inf }
 0x245   :  { %v4774_v56 = vpop.f32.mrf.mxu0  ;;  %v4776_v57 = vpop.f32.mrf.mxu1 }
 0x246   :  { %v1954_v58 = vsel %vm1929_vm3, %v4774_v56, -inf  ;;  %v1957_v61 = vsel %vm1929_vm3, %v4776_v57, -inf }
 0x24a   :  { %v1588_v39 = vpop.f32.mrf.mxu2  ;;  %v4745_v40 = vpop.f32.mrf.mxu3 }
 0x24b   :  { %v1936_v43 = vsel %vm1929_vm3, %v1588_v39, -inf  ;;  %v1939_v44 = vsel %vm1929_vm3, %v4745_v40, -inf }
 0x24c   :  { %1937 = vmax.xlane.f32.xlu0 %v1936_v43 }
 0x24f   :  { %v4788_v63 = vpop.f32.mrf.mxu0  ;;  %v4792_v42 = vpop.f32.mrf.mxu1 }
 0x250   :  { %v1966_v0 = vsel %vm1929_vm3, %v4788_v63, -inf  ;;  %v1969_v1 = vsel %vm1929_vm3, %v4792_v42, -inf }
 0x254   :  { %v4750_v45 = vpop.f32.mrf.mxu2  ;;  %v4752_v46 = vpop.f32.mrf.mxu3  ;;  %1940 = vmax.xlane.f32.xlu0 %v1939_v44 }
 0x255   :  { %v1951_v35 = vsel %vm1929_vm3, %v4752_v46, -inf  ;;  %v1948_v36 = vsel %vm1929_vm3, %v4750_v45, -inf }
 0x256   :  { %1952 = vmax.xlane.f32.xlu2 %v1951_v35  ;;  %1949 = vmax.xlane.f32.xlu1 %v1948_v36 }
 0x25c   :  { %1943 = vmax.xlane.f32.xlu0 %v1942_v47 }
 0x25e   :  { %v4766_v49 = vpop.f32.mrf.mxu2  ;;  %1946 = vmax.xlane.f32.xlu2 %v1945_v48  ;;  %v4770_v52 = vpop.f32.mrf.mxu3 }
 0x25f   :  { %v1960_v51 = vsel %vm1929_vm3, %v4766_v49, -inf  ;;  %v1963_v53 = vsel %vm1929_vm3, %v4770_v52, -inf }
 0x260   :  { %1961 = vmax.xlane.f32.xlu1 %v1960_v51 }
 0x264   :  { %1964 = vmax.xlane.f32.xlu0 %v1963_v53 }
 0x268   :  { %v4780_v59 = vpop.f32.mrf.mxu2  ;;  %1955 = vmax.xlane.f32.xlu1 %v1954_v58  ;;  %v4786_v62 = vpop.f32.mrf.mxu3 }
 0x269   :  { %v1972_v60 = vsel %vm1929_vm3, %v4780_v59, -inf  ;;  %v1975_v41 = vsel %vm1929_vm3, %v4786_v62, -inf }
 0x26a   :  { %1973 = vmax.xlane.f32.xlu2 %v1972_v60 }
 0x26c   :  { %1958 = vmax.xlane.f32.xlu0 %v1957_v61 }
 0x270   :  { %1976 = vmax.xlane.f32.xlu1 %v1975_v41 }
 0x272   :  { %1967 = vmax.xlane.f32.xlu2 %v1966_v0 }
 0x274   :  { %1970 = vmax.xlane.f32.xlu0 %v1969_v1 }
 0x2aa   :  { %v1935_v2 = vpop.xlane.xlu2 %1934  ;;  %v1932_v3 = vpop.xlane.xlu1 %1931 }
 0x2ab   :  { %v1979_v4 = vsub.f32 %v1562_v28, %v1935_v2  ;;  %v1978_v5 = vsub.f32 %v1536_v27, %v1932_v3 }
 0x2ad   :  { %v1996_v6 = vmul.f32 1.442695, %v1979_v4  ;;  %v1994_v7 = vmul.f32 1.442695, %v1978_v5 }
 0x2af   :  { %3610 = vpow2.f32 %v1996_v6 }
 0x2b0   :  { %3612 = vpow2.f32 %v1994_v7 }
 0x2b5   :  { %v4798_v8 = vpop.eup %3610 }
 0x2b6   :  { %v4800_v9 = vpop.eup %3612  ;;  %v2029_v11 = vsel %vm1929_vm3, %v4798_v8, 0.0 }
 0x2b7   :  { %v2026_v12 = vsel %vm1929_vm3, %v4800_v9, 0.0  ;;  %2030 = vadd.xlane.f32.xlu2 %v2029_v11 }
 0x2b8   :  { %2027 = vadd.xlane.f32.xlu0 %v2026_v12 }
 0x2bf   :  { %v1938_v13 = vpop.xlane.xlu0 %1937 }
 0x2c0   :  { %v1980_v14 = vsub.f32 %v1588_v39, %v1938_v13 }
 0x2c2   :  { %v1998_v15 = vmul.f32 1.442695, %v1980_v14 }
 0x2c4   :  { %3614 = vpow2.f32 %v1998_v15 }
 0x2c7   :  { %v1941_v16 = vpop.xlane.xlu0 %1940 }
 0x2c8   :  { %v1981_v17 = vsub.f32 %v4745_v40, %v1941_v16 }
 0x2c9   :  { %v1953_v54 = vpop.xlane.xlu2 %1952  ;;  %v1950_v55 = vpop.xlane.xlu1 %1949 }
 0x2ca   :  { %v4807_v18 = vpop.eup %3614  ;;  %v1985_v19 = vsub.f32 %v4752_v46, %v1953_v54  ;;  %v2000_v20 = vmul.f32 1.442695, %v1981_v17  ;;  %v1984_v21 = vsub.f32 %v4750_v45, %v1950_v55 }
 0x2cb   :  { %v2032_v22 = vsel %vm1929_vm3, %v4807_v18, 0.0 }
 0x2cc   :  { %v2008_v27 = vmul.f32 1.442695, %v1985_v19  ;;  %3616 = vpow2.f32 %v2000_v20  ;;  %v2006_v28 = vmul.f32 1.442695, %v1984_v21  ;;  %2033 = vadd.xlane.f32.xlu1 %v2032_v22 }
 0x2ce   :  { %3618 = vpow2.f32 %v2008_v27 }
 0x2cf   :  { %3620 = vpow2.f32 %v2006_v28  ;;  %v1944_v29 = vpop.xlane.xlu0 %1943 }
 0x2d0   :  { %v1982_v30 = vsub.f32 %v4758_v37, %v1944_v29 }
 0x2d1   :  { %v1947_v39 = vpop.xlane.xlu2 %1946 }
 0x2d2   :  { %v4814_v40 = vpop.eup %3616  ;;  %v1983_v43 = vsub.f32 %v4760_v38, %v1947_v39  ;;  %v2002_v44 = vmul.f32 1.442695, %v1982_v30 }
 0x2d3   :  { %v1962_v46 = vpop.xlane.xlu1 %1961  ;;  %v2035_v45 = vsel %vm1929_vm3, %v4814_v40, 0.0 }
 0x2d4   :  { %v4819_v35 = vpop.eup %3618  ;;  %v2004_v36 = vmul.f32 1.442695, %v1983_v43  ;;  %v1988_v47 = vsub.f32 %v4766_v49, %v1962_v46  ;;  %3622 = vpow2.f32 %v2002_v44  ;;  %2036 = vadd.xlane.f32.xlu2 %v2035_v45 }
 0x2d5   :  { %v4822_v48 = vpop.eup %3620  ;;  %v2047_v37 = vsel %vm1929_vm3, %v4819_v35, 0.0 }
 0x2d6   :  { %3624 = vpow2.f32 %v2004_v36  ;;  %v2014_v51 = vmul.f32 1.442695, %v1988_v47  ;;  %2048 = vadd.xlane.f32.xlu0 %v2047_v37  ;;  %v2044_v38 = vsel %vm1929_vm3, %v4822_v48, 0.0 }
 0x2d7   :  { %2045 = vadd.xlane.f32.xlu1 %v2044_v38  ;;  %v1965_v53 = vpop.xlane.xlu0 %1964 }
 0x2d8   :  { %3626 = vpow2.f32 %v2014_v51  ;;  %v1989_v58 = vsub.f32 %v4770_v52, %v1965_v53 }
 0x2da   :  { %v4829_v60 = vpop.eup %3622  ;;  %v2016_v49 = vmul.f32 1.442695, %v1989_v58 }
 0x2db   :  { %v1956_v61 = vpop.xlane.xlu1 %1955  ;;  %v2038_v1 = vsel %vm1929_vm3, %v4829_v60, 0.0 }
 0x2dc   :  { %v4831_v41 = vpop.eup %3624  ;;  %3628 = vpow2.f32 %v2016_v49  ;;  %v1986_v0 = vsub.f32 %v4774_v56, %v1956_v61 }
 0x2dd   :  { %v1974_v2 = vpop.xlane.xlu2 %1973  ;;  %v2041_v3 = vsel %vm1929_vm3, %v4831_v41, 0.0 }
 0x2de   :  { %v4838_v4 = vpop.eup %3626  ;;  %v1992_v52 = vsub.f32 %v4780_v59, %v1974_v2  ;;  %v2010_v5 = vmul.f32 1.442695, %v1986_v0  ;;  %2042 = vadd.xlane.f32.xlu0 %v2041_v3 }
 0x2df   :  { %2039 = vadd.xlane.f32.xlu1 %v2038_v1  ;;  %v2056_v6 = vsel %vm1929_vm3, %v4838_v4, 0.0  ;;  %v1959_v7 = vpop.xlane.xlu0 %1958 }
 0x2e0   :  { %v2022_v11 = vmul.f32 1.442695, %v1992_v52  ;;  %3630 = vpow2.f32 %v2010_v5  ;;  %2057 = vadd.xlane.f32.xlu2 %v2056_v6  ;;  %v1987_v56 = vsub.f32 %v4776_v57, %v1959_v7  ;;  %v3594_v52 = vld [vmem:[%s5426_s11 + $0x9] ss:$0 sm:$0xff]  ;;  %v3593_v7 = vld [vmem:[%s5426_s11 + $0x8] ss:$0 sm:$0xff] }
 0x2e2   :  { %v4844_v12 = vpop.eup %3628  ;;  %3632 = vpow2.f32 %v2022_v11  ;;  %v2012_v13 = vmul.f32 1.442695, %v1987_v56 }
 0x2e3   :  { %v1977_v14 = vpop.xlane.xlu1 %1976  ;;  %v2059_v15 = vsel %vm1929_vm3, %v4844_v12, 0.0 }
 0x2e4   :  { %3634 = vpow2.f32 %v2012_v13  ;;  %v1993_v59 = vsub.f32 %v4786_v62, %v1977_v14 }
 0x2e5   :  { %v1968_v16 = vpop.xlane.xlu2 %1967 }
 0x2e6   :  { %v4849_v17 = vpop.eup %3630  ;;  %v2024_v54 = vmul.f32 1.442695, %v1993_v59  ;;  %v1990_v55 = vsub.f32 %v4788_v63, %v1968_v16  ;;  %v1391_v16 = vadd.f32 %v3594_v52, %v4729_v24 }
 0x2e7   :  { %2060 = vadd.xlane.f32.xlu1 %v2059_v15  ;;  %v2050_v57 = vsel %vm1929_vm3, %v4849_v17, 0.0  ;;  %v1971_v19 = vpop.xlane.xlu0 %1970 }
 0x2e8   :  { %v4854_v20 = vpop.eup %3632  ;;  %3636 = vpow2.f32 %v2024_v54  ;;  %v2018_v21 = vmul.f32 1.442695, %v1990_v55  ;;  %2051 = vadd.xlane.f32.xlu2 %v2050_v57  ;;  %v1991_v62 = vsub.f32 %v4792_v42, %v1971_v19  ;;  %v1371_v55 = vadd.f32 %v3593_v7, %v4727_v23 }
 0x2e9   :  { %v2068_v22 = vsel %vm1929_vm3, %v4854_v20, 0.0 }
 0x2ea   :  { %v4859_v27 = vpop.eup %3634  ;;  %3638 = vpow2.f32 %v2018_v21  ;;  %2069 = vadd.xlane.f32.xlu0 %v2068_v22  ;;  %v2020_v63 = vmul.f32 1.442695, %v1991_v62  ;;  %v3597_v22 = vld [vmem:[%s5426_s11 + $0xc] ss:$0 sm:$0xff] }
 0x2eb   :  { %v2053_v28 = vsel %vm1929_vm3, %v4859_v27, 0.0 }
 0x2ec   :  { %3640 = vpow2.f32 %v2020_v63 }
 0x2ee   :  { %v4863_v29 = vpop.eup %3636 }
 0x2ef   :  { %2054 = vadd.xlane.f32.xlu1 %v2053_v28  ;;  %v2071_v30 = vsel %vm1929_vm3, %v4863_v29, 0.0 }
 0x2f0   :  { %v4867_v39 = vpop.eup %3638  ;;  %2072 = vadd.xlane.f32.xlu2 %v2071_v30  ;;  %v3598_v30 = vld [vmem:[%s5426_s11 + $0xd] ss:$0 sm:$0xff] }
 0x2f1   :  { %v2062_v42 = vsel %vm1929_vm3, %v4867_v39, 0.0 }
 0x2f2   :  { %v4871_v43 = vpop.eup %3640  ;;  %2063 = vadd.xlane.f32.xlu0 %v2062_v42  ;;  %v3599_v42 = vld [vmem:[%s5426_s11 + $0xa] ss:$0 sm:$0xff] }
 0x2f3   :  { %v2065_v44 = vsel %vm1929_vm3, %v4871_v43, 0.0 }
 0x2f7   :  { %2066 = vadd.xlane.f32.xlu1 %v2065_v44  ;;  %v3600_v44 = vld [vmem:[%s5426_s11 + $0xb] ss:$0 sm:$0xff] }
 0x32a   :  { %v2031_v46 = vpop.xlane.xlu2 %2030 }
 0x32b   :  { %v2028_v45 = vpop.xlane.xlu0 %2027  ;;  %3642 = vrcp.f32 %v2031_v46  ;;  %v2100_v58 = vand.u32 2147483648, %v2031_v46  ;;  %v2098_v0 = vand.u32 2147483647, %v2031_v46  ;;  %vm2094_vm6 = vweird.f32 %v2031_v46 }
 0x32c   :  { %3644 = vrcp.f32 %v2028_v45  ;;  %v2085_v49 = vand.u32 2147483648, %v2028_v45  ;;  %v2083_v2 = vand.u32 2147483647, %v2028_v45  ;;  %vm2079_vm7 = vweird.f32 %v2028_v45 }
 0x32d   :  { %v2101_v6 = vor.u32 1.1754944e-38, %v2100_v58  ;;  %vm2099_vm10 = vcmp.eq.f32.partialorder %v2098_v0, 8.507059e+37  ;;  %v4925_v0 = vadd.f32 %v3600_v44, %v4739_v32 }
 0x32e   :  { %v2086_v11 = vor.u32 1.1754944e-38, %v2085_v49  ;;  %vm2084_vm11 = vcmp.eq.f32.partialorder %v2083_v2, 8.507059e+37  ;;  %v4921_v49 = vadd.f32 %v3598_v30, %v4733_v26 }
 0x331   :  { %v3643_v36 = vpop.eup %3642 }
 0x332   :  { %v3645_v47 = vpop.eup %3644  ;;  %v2090_v37 = vmul.f32 %v3643_v36, %v2031_v46  ;;  %vm2095_vm4 = vweird.f32 %v3643_v36  ;;  %v3601_v46 = vld [vmem:[%s5426_s11 + $0xe] ss:$0 sm:$0xff] }
 0x333   :  { %v2075_v51 = vmul.f32 %v3645_v47, %v2028_v45  ;;  %vm2080_vm5 = vweird.f32 %v3645_v47  ;;  %vm2096_vm8 = vmor %vm2094_vm6, %vm2095_vm4 }
 0x334   :  { %v2091_v38 = vsub.f32 1.0, %v2090_v37  ;;  %vm2081_vm9 = vmor %vm2079_vm7, %vm2080_vm5 }
 0x335   :  { %v2076_v53 = vsub.f32 1.0, %v2075_v51  ;;  %v4915_v51 = vadd.f32 %v3597_v22, %v4731_v25  ;;  %v4930_v25 = vadd.f32 %v3601_v46, %v4741_v33 }
 0x336   :  { %v2092_v61 = vmul.f32 %v3643_v36, %v2091_v38 }
 0x337   :  { %v2077_v1 = vmul.f32 %v3645_v47, %v2076_v53 }
 0x338   :  { %v2093_v3 = vadd.f32 %v3643_v36, %v2092_v61  ;;  %v1411_v61 = vadd.f32 %v3599_v42, %v4737_v31 }
 0x339   :  { %v2078_v5 = vadd.f32 %v3645_v47, %v2077_v1 }
 0x33a   :  { %v2097_v56 = vsel %vm2096_vm8, %v3643_v36, %v2093_v3 }
 0x33b   :  { %v2082_v13 = vsel %vm2081_vm9, %v3645_v47, %v2078_v5  ;;  %v2102_v14 = vsel %vm2099_vm10, %v2101_v6, %v2097_v56  ;;  %v3602_v47 = vld [vmem:[%s5426_s11 + $0xf] ss:$0 sm:$0xff] }
 0x33c   :  { %v2087_v59 = vsel %vm2084_vm11, %v2086_v11, %v2082_v13  ;;  %v2103_v15 = vmul.f32 %v4798_v8, %v2102_v14  ;;  %v4938_v6 = vadd.f32 %v3602_v47, %v4743_v34 }
 0x33d   :  { %v2088_v54 = vmul.f32 %v4800_v9, %v2087_v59 }
 0x33e   :  { %3494 = vmatmul.msk.f32.vlgmr.msra.gmra.mxu1 %vm1929_vm3, %v2103_v15 }
 0x33f   :  { %3493 = vmatmul.msk.f32.vlgmr.msra.gmra.mxu0 %vm1929_vm3, %v2088_v54  ;;  %2539 = vmatpush.msra.mxu1 %v1391_v16  ;;  %v2034_v57 = vpop.xlane.xlu1 %2033 }
 0x340   :  { %2516 = vmatpush.msra.mxu0 %v1371_v55  ;;  %3646 = vrcp.f32 %v2034_v57  ;;  %v2115_v9 = vand.u32 2147483648, %v2034_v57  ;;  %v2113_v28 = vand.u32 2147483647, %v2034_v57  ;;  %vm2109_vm13 = vweird.f32 %v2034_v57 }
 0x342   :  { %v2116_v37 = vor.u32 1.1754944e-38, %v2115_v9  ;;  %vm2114_vm15 = vcmp.eq.f32.partialorder %v2113_v28, 8.507059e+37 }
 0x346   :  { %v3647_v19 = vpop.eup %3646 }
 0x347   :  { %v2105_v21 = vmul.f32 %v3647_v19, %v2034_v57  ;;  %v4887_v62 = vpop.xlane.xlu2 %2036  ;;  %vm2110_vm12 = vweird.f32 %v3647_v19 }
 0x348   :  { %3648 = vrcp.f32 %v4887_v62  ;;  %vm2111_vm14 = vmor %vm2109_vm13, %vm2110_vm12  ;;  %v2130_v32 = vand.u32 2147483648, %v4887_v62  ;;  %v2128_v56 = vand.u32 2147483647, %v4887_v62  ;;  %vm2124_vm5 = vweird.f32 %v4887_v62 }
 0x349   :  { %v2106_v8 = vsub.f32 1.0, %v2105_v21  ;;  %v4890_v24 = vpop.xlane.xlu0 %2048 }
 0x34a   :  { %3650 = vrcp.f32 %v4890_v24  ;;  %v4893_v23 = vpop.xlane.xlu1 %2045  ;;  %v2188_v34 = vand.u32 2147483647, %v4890_v24  ;;  %v2190_v14 = vand.u32 2147483648, %v4890_v24  ;;  %v2131_v57 = vor.u32 1.1754944e-38, %v2130_v32 }
 0x34b   :  { %v2107_v63 = vmul.f32 %v3647_v19, %v2106_v8  ;;  %3652 = vrcp.f32 %v4893_v23  ;;  %v2173_v59 = vand.u32 2147483647, %v4893_v23  ;;  %v2175_v15 = vand.u32 2147483648, %v4893_v23 }
 0x34c   :  { %vm2184_vm7 = vweird.f32 %v4890_v24  ;;  %vm2169_vm8 = vweird.f32 %v4893_v23  ;;  %vm2129_vm9 = vcmp.eq.f32.partialorder %v2128_v56, 8.507059e+37  ;;  %vm4964_vm10 = vcmp.eq.f32.partialorder %v2188_v34, 8.507059e+37 }
 0x34d   :  { %v2108_v45 = vadd.f32 %v3647_v19, %v2107_v63  ;;  %v2191_v22 = vor.u32 1.1754944e-38, %v2190_v14  ;;  %vm4970_vm12 = vcmp.eq.f32.partialorder %v2173_v59, 8.507059e+37  ;;  %v2176_v28 = vor.u32 1.1754944e-38, %v2175_v15 }
 0x34e   :  { %v3649_v36 = vpop.eup %3648 }
 0x34f   :  { %v2112_v38 = vsel %vm2111_vm14, %v3647_v19, %v2108_v45  ;;  %v2120_v53 = vmul.f32 %v3649_v36, %v4887_v62  ;;  %vm2125_vm4 = vweird.f32 %v3649_v36 }
 0x350   :  { %v4918_v58 = vpop.eup %3650  ;;  %v2117_v1 = vsel %vm2114_vm15, %v2116_v37, %v2112_v38  ;;  %vm2126_vm6 = vmor %vm2124_vm5, %vm2125_vm4 }
 0x351   :  { %v4927_v2 = vpop.eup %3652  ;;  %v2180_v3 = vmul.f32 %v4918_v58, %v4890_v24  ;;  %v2121_v52 = vsub.f32 1.0, %v2120_v53  ;;  %v4934_v5 = vpop.xlane.xlu0 %2042  ;;  %v2118_v26 = vmul.f32 %v4807_v18, %v2117_v1  ;;  %vm2185_vm13 = vweird.f32 %v4918_v58 }
 0x352   :  { %v2165_v31 = vmul.f32 %v4927_v2, %v4893_v23  ;;  %3654 = vrcp.f32 %v4934_v5  ;;  %v4944_v33 = vpop.xlane.xlu1 %2039  ;;  %vm2170_vm11 = vweird.f32 %v4927_v2  ;;  %vm2154_vm14 = vweird.f32 %v4934_v5  ;;  %vm5007_vm4 = vmor %vm2184_vm7, %vm2185_vm13 }
 0x353   :  { %v2181_v7 = vsub.f32 1.0, %v2180_v3  ;;  %v2122_v11 = vmul.f32 %v3649_v36, %v2121_v52  ;;  %v4947_v13 = vpop.xlane.xlu2 %2057  ;;  %3495 = vmatmul.msk.f32.vlgmr.msra.gmra.mxu2 %vm1929_vm3, %v2118_v26  ;;  %3656 = vrcp.f32 %v4944_v33  ;;  %vm4986_vm15 = vmor %vm2169_vm8, %vm2170_vm11  ;;  %v2158_v37 = vand.u32 2147483647, %v4934_v5 }
 0x354   :  { %v2166_v18 = vsub.f32 1.0, %v2165_v31  ;;  %2562 = vmatpush.msra.mxu2 %v1411_v61  ;;  %3658 = vrcp.f32 %v4947_v13  ;;  %v2160_v38 = vand.u32 2147483648, %v4934_v5  ;;  %v2143_v23 = vand.u32 2147483647, %v4944_v33 }
 0x355   :  { %v2123_v16 = vadd.f32 %v3649_v36, %v2122_v11  ;;  %v2182_v54 = vmul.f32 %v4918_v58, %v2181_v7  ;;  %v2145_v1 = vand.u32 2147483648, %v4944_v33  ;;  %vm2139_vm5 = vweird.f32 %v4944_v33 }
 0x356   :  { %v2167_v55 = vmul.f32 %v4927_v2, %v2166_v18  ;;  %v2235_v31 = vand.u32 2147483648, %v4947_v13  ;;  %v2233_v11 = vand.u32 2147483647, %v4947_v13  ;;  %vm5031_vm7 = vcmp.eq.f32.partialorder %v2158_v37, 8.507059e+37 }
 0x357   :  { %v2127_v19 = vsel %vm2126_vm6, %v3649_v36, %v2123_v16  ;;  %v2183_v44 = vadd.f32 %v4918_v58, %v2182_v54  ;;  %v2161_v59 = vor.u32 1.1754944e-38, %v2160_v38  ;;  %vm2229_vm8 = vweird.f32 %v4947_v13 }
 0x358   :  { %v4962_v21 = vpop.eup %3654  ;;  %v2168_v8 = vadd.f32 %v4927_v2, %v2167_v55  ;;  %v2132_v9 = vsel %vm2129_vm9, %v2131_v57, %v2127_v19  ;;  %vm5041_vm9 = vcmp.eq.f32.partialorder %v2143_v23, 8.507059e+37  ;;  %v2146_v16 = vor.u32 1.1754944e-38, %v2145_v1 }
 0x359   :  { %v2150_v30 = vmul.f32 %v4962_v21, %v4934_v5  ;;  %v4976_v42 = vpop.eup %3656  ;;  %v2133_v45 = vmul.f32 %v4814_v40, %v2132_v9  ;;  %v2187_v24 = vsel %vm5007_vm4, %v4918_v58, %v2183_v44  ;;  %vm2155_vm6 = vweird.f32 %v4962_v21 }
 0x35a   :  { %v4981_v46 = vpop.xlane.xlu1 %2060  ;;  %v2135_v53 = vmul.f32 %v4976_v42, %v4944_v33  ;;  %v4994_v61 = vpop.eup %3658  ;;  %v2172_v40 = vsel %vm4986_vm15, %v4927_v2, %v2168_v8  ;;  %v5039_v58 = vsel %vm4964_vm10, %v2191_v22, %v2187_v24  ;;  %v2236_v55 = vor.u32 1.1754944e-38, %v2235_v31  ;;  %vm5052_vm11 = vmor %vm2154_vm14, %vm2155_vm6 }
 0x35b   :  { %v2151_v47 = vsub.f32 1.0, %v2150_v30  ;;  %3660 = vrcp.f32 %v4981_v46  ;;  %3496 = vmatmul.msk.f32.vlgmr.msrb.gmra.mxu3 %vm1929_vm3, %v2133_v45  ;;  %v2225_v2 = vmul.f32 %v4994_v61, %v4947_v13  ;;  %v5018_v7 = vpop.xlane.xlu2 %2051  ;;  %v2177_v56 = vsel %vm4970_vm12, %v2176_v28, %v2172_v40 }
 0x35c   :  { %v2136_v26 = vsub.f32 1.0, %v2135_v53  ;;  %2585 = vmatpush.msrb.mxu3 %v4925_v0  ;;  %vm2140_vm10 = vweird.f32 %v4976_v42  ;;  %v2250_v8 = vand.u32 2147483648, %v4981_v46  ;;  %v2178_v9 = vmul.f32 %v4822_v48, %v2177_v56 }
 0x35d   :  { %v2152_v52 = vmul.f32 %v4962_v21, %v2151_v47  ;;  %v5016_v32 = vpop.xlane.xlu0 %2069  ;;  %v2226_v14 = vsub.f32 1.0, %v2225_v2  ;;  %vm5066_vm12 = vcmp.eq.f32.partialorder %v2233_v11, 8.507059e+37  ;;  %vm2244_vm13 = vweird.f32 %v4981_v46  ;;  %vm5093_vm4 = vmor %vm2139_vm5, %vm2140_vm10 }
 0x35e   :  { %3662 = vrcp.f32 %v5016_v32  ;;  %v2137_v18 = vmul.f32 %v4976_v42, %v2136_v26  ;;  %v2295_v62 = vand.u32 2147483648, %v5016_v32  ;;  %vm2230_vm14 = vweird.f32 %v4994_v61  ;;  %3499 = vmatmul.msk.f32.vlgmr.msrb.gmra.mxu2 %vm1929_vm3, %v2178_v9 }
 0x35f   :  { %v2153_v34 = vadd.f32 %v4962_v21, %v2152_v52  ;;  %3664 = vrcp.f32 %v5018_v7  ;;  %v2227_v54 = vmul.f32 %v4994_v61, %v2226_v14  ;;  %vm2289_vm15 = vweird.f32 %v5016_v32  ;;  %2654 = vmatpush.msrb.mxu2 %v4930_v25  ;;  %vm5113_vm5 = vmor %vm2229_vm8, %vm2230_vm14 }
 0x360   :  { %v2138_v5 = vadd.f32 %v4976_v42, %v2137_v18  ;;  %v2248_v48 = vand.u32 2147483647, %v4981_v46  ;;  %v2293_v36 = vand.u32 2147483647, %v5016_v32  ;;  %v5097_v23 = vor.u32 1.1754944e-38, %v2295_v62 }
 0x361   :  { %v5046_v57 = vpop.eup %3660  ;;  %v2157_v63 = vsel %vm5052_vm11, %v4962_v21, %v2153_v34  ;;  %v2228_v21 = vadd.f32 %v4994_v61, %v2227_v54  ;;  %v5099_v1 = vor.u32 1.1754944e-38, %v2250_v8  ;;  %vm2199_vm6 = vweird.f32 %v5018_v7 }
 0x362   :  { %v5060_v22 = vpop.xlane.xlu1 %2054  ;;  %v2240_v30 = vmul.f32 %v5046_v57, %v4981_v46  ;;  %v2162_v53 = vsel %vm5031_vm7, %v2161_v59, %v2157_v63  ;;  %v2142_v25 = vsel %vm5093_vm4, %v4976_v42, %v2138_v5  ;;  %vm2245_vm7 = vweird.f32 %v5046_v57  ;;  %v2686_v46 = vld [vmem:[%s5427_s12 + $0x10] sm:$0xf] }
 0x363   :  { %3666 = vrcp.f32 %v5060_v22  ;;  %v5107_v33 = vpop.xlane.xlu2 %2072  ;;  %v2203_v31 = vand.u32 2147483647, %v5018_v7  ;;  %v2205_v42 = vand.u32 2147483648, %v5018_v7  ;;  %v2232_v24 = vsel %vm5113_vm5, %v4994_v61, %v2228_v21 }
 0x364   :  { %v5073_v44 = vpop.eup %3662  ;;  %v2241_v47 = vsub.f32 1.0, %v2240_v30  ;;  %vm5125_vm11 = vcmp.eq.f32.partialorder %v2293_v36, 8.507059e+37  ;;  %vm5129_vm8 = vcmp.eq.f32.partialorder %v2248_v48, 8.507059e+37  ;;  %v2218_v18 = vand.u32 2147483647, %v5060_v22 }
 0x365   :  { %v2285_v45 = vmul.f32 %v5073_v44, %v5016_v32  ;;  %v5085_v37 = vpop.xlane.xlu0 %2063  ;;  %v3665_v38 = vpop.eup %3664  ;;  %v2147_v0 = vsel %vm5041_vm9, %v2146_v16, %v2142_v25  ;;  %vm2290_vm10 = vweird.f32 %v5073_v44  ;;  %v2237_v62 = vsel %vm5066_vm12, %v2236_v55, %v2232_v24  ;;  %vm5147_vm9 = vmor %vm2244_vm13, %vm2245_vm7  ;;  %v2692_v32 = vld [vmem:[%s5427_s12 + $0x28] sm:$0xf] }
 0x366   :  { %v2242_v52 = vmul.f32 %v5046_v57, %v2241_v47  ;;  %v2195_v26 = vmul.f32 %v3665_v38, %v5018_v7  ;;  %3668 = vrcp.f32 %v5085_v37  ;;  %vm2200_vm14 = vweird.f32 %v3665_v38  ;;  %vm5158_vm5 = vmor %vm2289_vm15, %vm2290_vm10 }
 0x367   :  { %v2286_v3 = vsub.f32 1.0, %v2285_v45  ;;  %3670 = vrcp.f32 %v5107_v33  ;;  %vm5151_vm4 = vcmp.eq.f32.partialorder %v2203_v31, 8.507059e+37  ;;  %v2206_v8 = vor.u32 1.1754944e-38, %v2205_v42  ;;  %vm5172_vm7 = vmor %vm2199_vm6, %vm2200_vm14 }
 0x368   :  { %v2196_v34 = vsub.f32 1.0, %v2195_v26  ;;  %v2243_v61 = vadd.f32 %v5046_v57, %v2242_v52  ;;  %v2220_v9 = vand.u32 2147483648, %v5060_v22  ;;  %vm2214_vm12 = vweird.f32 %v5060_v22 }
 0x369   :  { %v2287_v11 = vmul.f32 %v5073_v44, %v2286_v3  ;;  %v3667_v14 = vpop.eup %3666  ;;  %vm5163_vm13 = vcmp.eq.f32.partialorder %v2218_v18, 8.507059e+37  ;;  %v2148_v48 = vmul.f32 %v4829_v60, %v2147_v0  ;;  %v2163_v21 = vmul.f32 %v4831_v41, %v2162_v53 }
 0x36a   :  { %v2197_v54 = vmul.f32 %v3665_v38, %v2196_v34  ;;  %v2210_v19 = vmul.f32 %v3667_v14, %v5060_v22  ;;  %v2247_v30 = vsel %vm5147_vm9, %v5046_v57, %v2243_v61  ;;  %vm2215_vm15 = vweird.f32 %v3667_v14  ;;  %v5184_v7 = vpop.xlane.xlu1 %2066 }
 0x36b   :  { %v2288_v59 = vadd.f32 %v5073_v44, %v2287_v11  ;;  %v2221_v25 = vor.u32 1.1754944e-38, %v2220_v9  ;;  %vm2259_vm6 = vweird.f32 %v5085_v37  ;;  %3497 = vmatmul.msk.f32.vlgmr.msrb.gmra.mxu0 %vm1929_vm3, %v2148_v48  ;;  %3498 = vmatmul.msk.f32.vlgmr.msrb.gmra.mxu1 %vm1929_vm3, %v2163_v21  ;;  %v2193_v60 = vmul.f32 %v4819_v35, %v5039_v58  ;;  %vm2216_vm10 = vmor %vm2214_vm12, %vm2215_vm15  ;;  %v2684_v9 = vld [vmem:[%s5427_s12 + $0x8] sm:$0xf]  ;;  %v2690_v21 = vld [vmem:[%s5427_s12 + $0x20] sm:$0xf] }
 0x36c   :  { %v2198_v55 = vadd.f32 %v3665_v38, %v2197_v54  ;;  %v2211_v5 = vsub.f32 1.0, %v2210_v19  ;;  %v3669_v28 = vpop.eup %3668  ;;  %v2238_v41 = vmul.f32 %v4838_v4, %v2237_v62  ;;  %2608 = vmatpush.msrb.mxu0 %v4915_v51  ;;  %2631 = vmatpush.msrb.mxu1 %v4921_v49  ;;  %v2252_v35 = vsel %vm5129_vm8, %v5099_v1, %v2247_v30  ;;  %v2689_v30 = vld [vmem:[%s5427_s12 + $0x1c] sm:$0xf] }
 0x36d   :  { %v2292_v45 = vsel %vm5158_vm5, %v5073_v44, %v2288_v59  ;;  %v2255_v57 = vmul.f32 %v3669_v28, %v5085_v37  ;;  %v3671_v40 = vpop.eup %3670  ;;  %v2265_v4 = vand.u32 2147483648, %v5085_v37  ;;  %3500 = vmatmul.msk.f32.vlgmr.msra.gmra.mxu3 %vm1929_vm3, %v2193_v60  ;;  %3672 = vrcp.f32 %v5184_v7 }
 0x36e   :  { %v2202_v36 = vsel %vm5172_vm7, %v3665_v38, %v2198_v55  ;;  %v2212_v47 = vmul.f32 %v3667_v14, %v2211_v5  ;;  %v2300_v3 = vmul.f32 %v3671_v40, %v5107_v33  ;;  %v2297_v52 = vsel %vm5125_vm11, %v5097_v23, %v2292_v45  ;;  %3503 = vmatmul.msk.f32.vlgmr.msra.gmra.mxu2 %vm1929_vm3, %v2238_v41  ;;  %v2688_v5 = vld [vmem:[%s5427_s12 + $0x18] sm:$0xf]  ;;  %v2691_v45 = vld [vmem:[%s5427_s12 + $0x24] sm:$0xf] }
 0x36f   :  { %v2207_v44 = vsel %vm5151_vm4, %v2206_v8, %v2202_v36  ;;  %v2256_v53 = vsub.f32 1.0, %v2255_v57  ;;  %vm2260_vm14 = vweird.f32 %v3669_v28  ;;  %2677 = vmatpush.msra.mxu3 %v4938_v6  ;;  %v2263_v22 = vand.u32 2147483647, %v5085_v37  ;;  %v2683_v8 = vld [vmem:[%s5427_s12 + $0x4] sm:$0xf]  ;;  %3513 = vmatpush.msk.msra.mxu2 %vm92_vm0, %v2684_v9 }
 0x370   :  { %v2213_v38 = vadd.f32 %v3667_v14, %v2212_v47  ;;  %v2301_v58 = vsub.f32 1.0, %v2300_v3  ;;  %v2310_v1 = vand.u32 2147483648, %v5107_v33  ;;  %v2208_v26 = vmul.f32 %v4849_v17, %v2207_v44  ;;  %vm2261_vm8 = vmor %vm2259_vm6, %vm2260_vm14  ;;  %v2693_v36 = vld [vmem:[%s5427_s12 + $0x2c] sm:$0xf]  ;;  %v2696_v57 = vld [vmem:[%s5427_s12 + $0x38] sm:$0xf] }
 0x371   :  { %v2257_v49 = vmul.f32 %v3669_v28, %v2256_v53  ;;  %vm2305_vm11 = vweird.f32 %v3671_v40  ;;  %v2308_v24 = vand.u32 2147483647, %v5107_v33  ;;  %v2253_v6 = vmul.f32 %v4844_v12, %v2252_v35  ;;  %v2697_v53 = vld [vmem:[%s5427_s12 + $0x3c] sm:$0xf] }
 0x372   :  { %v2217_v51 = vsel %vm2216_vm10, %v3667_v14, %v2213_v38  ;;  %v2302_v31 = vmul.f32 %v3671_v40, %v2301_v58  ;;  %v2298_v11 = vmul.f32 %v4854_v20, %v2297_v52  ;;  %v2266_v56 = vor.u32 1.1754944e-38, %v2265_v4 }
 0x373   :  { %v2222_v23 = vsel %vm5163_vm13, %v2221_v25, %v2217_v51  ;;  %v2258_v2 = vadd.f32 %v3669_v28, %v2257_v49  ;;  %vm2304_vm9 = vweird.f32 %v5107_v33  ;;  %v3673_v17 = vpop.eup %3672  ;;  %vm2264_vm4 = vcmp.eq.f32.partialorder %v2263_v22, 8.507059e+37  ;;  %3501 = vmatmul.msk.f32.vlgmr.msra.gmra.mxu0 %vm1929_vm3, %v2208_v26  ;;  %v2695_v25 = vld [vmem:[%s5427_s12 + $0x34] sm:$0xf] }
 0x374   :  { %v2223_v42 = vmul.f32 %v4859_v27, %v2222_v23  ;;  %v2303_v34 = vadd.f32 %v3671_v40, %v2302_v31  ;;  %vm2306_vm5 = vmor %vm2304_vm9, %vm2305_vm11  ;;  %v2311_v18 = vor.u32 1.1754944e-38, %v2310_v1  ;;  %v2270_v14 = vmul.f32 %v3673_v17, %v5184_v7 }
 0x375   :  { %v2262_v13 = vsel %vm2261_vm8, %v3669_v28, %v2258_v2  ;;  %vm2309_vm12 = vcmp.eq.f32.partialorder %v2308_v24, 8.507059e+37  ;;  %3504 = vmatmul.msk.f32.vlgmr.msrb.gmra.mxu3 %vm1929_vm3, %v2253_v6  ;;  %v2280_v33 = vand.u32 2147483648, %v5184_v7  ;;  %vm2275_vm13 = vweird.f32 %v3673_v17  ;;  %v2687_v28 = vld [vmem:[%s5427_s12 + $0x14] sm:$0xf] }
 0x376   :  { %3502 = vmatmul.msk.f32.vlgmr.msra.gmra.mxu1 %vm1929_vm3, %v2223_v42  ;;  %v2267_v27 = vsel %vm2264_vm4, %v2266_v56, %v2262_v13  ;;  %v2307_v37 = vsel %vm2306_vm5, %v3671_v40, %v2303_v34  ;;  %3507 = vmatmul.msk.f32.vlgmr.msrb.gmra.mxu2 %vm1929_vm3, %v2298_v11  ;;  %v2271_v20 = vsub.f32 1.0, %v2270_v14  ;;  %v2278_v59 = vand.u32 2147483647, %v5184_v7  ;;  %v2694_v40 = vld [vmem:[%s5427_s12 + $0x30] sm:$0xf] }
 0x377   :  { %v2312_v12 = vsel %vm2309_vm12, %v2311_v18, %v2307_v37  ;;  %v2268_v0 = vmul.f32 %v4867_v39, %v2267_v27  ;;  %vm2274_vm7 = vweird.f32 %v5184_v7  ;;  %v2281_v62 = vor.u32 1.1754944e-38, %v2280_v33  ;;  %3511 = vmatpush.msk.msra.mxu1 %vm92_vm0, %v2683_v8  ;;  %3521 = vmatpush.msk.msrb.mxu2 %vm92_vm0, %v2688_v5  ;;  %v3603_v27 = vld [vmem:[%s5428_s13] ss:$0 sm:$0xff] }
 0x378   :  { %v2272_v61 = vmul.f32 %v3673_v17, %v2271_v20  ;;  %v2313_v54 = vmul.f32 %v4863_v29, %v2312_v12  ;;  %vm2276_vm15 = vmor %vm2274_vm7, %vm2275_vm13  ;;  %vm2279_vm6 = vcmp.eq.f32.partialorder %v2278_v59, 8.507059e+37  ;;  %v2682_v29 = vld [vmem:[%s5427_s12] sm:$0xf]  ;;  %vm3250_vm9 = vcmask 523264  }
 0x379   :  { %3509 = vmatpush.msk.msra.mxu0 %vm92_vm0, %v2682_v29 }
 0x37a   :  { %v2273_v19 = vadd.f32 %v3673_v17, %v2272_v61 }
 0x37b   :  { %3505 = vmatmul.msk.f32.vlgmr.msrb.gmra.mxu0 %vm1929_vm3, %v2268_v0 }
 0x37c   :  { %v2277_v15 = vsel %vm2276_vm15, %v3673_v17, %v2273_v19  ;;  %3517 = vmatpush.msk.msrb.mxu0 %vm92_vm0, %v2686_v46 }
 0x37d   :  { %v2282_v16 = vsel %vm2279_vm6, %v2281_v62, %v2277_v15  ;;  %3508 = vmatmul.msk.f32.vlgmr.msra.gmra.mxu3 %vm1929_vm3, %v2313_v54  ;;  %vm3339_vm6 = vcmask 130048  }
 0x37e   :  { %v2283_v39 = vmul.f32 %v4871_v43, %v2282_v16  ;;  %v2685_v43 = vld [vmem:[%s5427_s12 + $0xc] sm:$0xf] }
 0x37f   :  { %3515 = vmatpush.msk.msrb.mxu3 %vm92_vm0, %v2685_v43 }
 0x380   :  { %3506 = vmatmul.msk.f32.vlgmr.msrb.gmra.mxu1 %vm1929_vm3, %v2283_v39 }
 0x381   :  { %3519 = vmatpush.msk.msrb.mxu1 %vm92_vm0, %v2687_v28  ;;  %3523 = vmatpush.msk.msra.mxu3 %vm92_vm0, %v2689_v30 }
 0x3bb   :  { %v2357_v63 = vpop.f32.mrf.mxu1 }
 0x3bc   :  { %v2334_v55 = vpop.f32.mrf.mxu0  ;;  %3512 = vmatmul.msk.f32.vlgmr.msra.gmra.mxu1 %vm85_vm1, %v2357_v63 }
 0x3bd   :  { %3510 = vmatmul.msk.f32.vlgmr.msra.gmra.mxu0 %vm85_vm1, %v2334_v55  ;;  %3527 = vmatpush.msk.msra.mxu1 %vm92_vm0, %v2691_v45 }
 0x3be   :  { %3525 = vmatpush.msk.msra.mxu0 %vm92_vm0, %v2690_v21 }
 0x3d6   :  { %v2380_v48 = vpop.f32.mrf.mxu2 }
 0x3d7   :  { %3514 = vmatmul.msk.f32.vlgmr.msra.gmra.mxu2 %vm85_vm1, %v2380_v48 }
 0x3d8   :  { %3529 = vmatpush.msk.msra.mxu2 %vm92_vm0, %v2692_v32 }
 0x3de   :  { %v2403_v47 = vpop.f32.mrf.mxu3 }
 0x3df   :  { %3516 = vmatmul.msk.f32.vlgmr.msrb.gmra.mxu3 %vm85_vm1, %v2403_v47 }
 0x3e0   :  { %3531 = vmatpush.msk.msrb.mxu3 %vm92_vm0, %v2693_v36 }
 0x3e1   :  { %v2472_v7 = vpop.f32.mrf.mxu2 }
 0x3e2   :  { %3522 = vmatmul.msk.f32.vlgmr.msrb.gmra.mxu2 %vm85_vm1, %v2472_v7 }
 0x3e3   :  { %3537 = vmatpush.msk.msrb.mxu2 %vm92_vm0, %v2696_v57 }
 0x3e8   :  { %v2426_v60 = vpop.f32.mrf.mxu0  ;;  %v2449_v41 = vpop.f32.mrf.mxu1 }
 0x3e9   :  { %3518 = vmatmul.msk.f32.vlgmr.msrb.gmra.mxu0 %vm85_vm1, %v2426_v60  ;;  %3520 = vmatmul.msk.f32.vlgmr.msrb.gmra.mxu1 %vm85_vm1, %v2449_v41 }
 0x3ea   :  { %3533 = vmatpush.msk.msrb.mxu0 %vm92_vm0, %v2694_v40  ;;  %3535 = vmatpush.msk.msrb.mxu1 %vm92_vm0, %v2695_v25 }
 0x3f0   :  { %v2495_v44 = vpop.f32.mrf.mxu3  ;;  %v2518_v3 = vpop.f32.mrf.mxu0 }
 0x3f1   :  { %v2564_v38 = vpop.f32.mrf.mxu2  ;;  %3524 = vmatmul.msk.f32.vlgmr.msra.gmra.mxu3 %vm85_vm1, %v2495_v44  ;;  %3526 = vmatmul.msk.f32.vlgmr.msra.gmra.mxu0 %vm85_vm1, %v2518_v3  ;;  %v3202_v44 = vld [vmem:[%s5431_s16 + $0x18] sm:$0xff] }
 0x3f2   :  { %3530 = vmatmul.msk.f32.vlgmr.msra.gmra.mxu2 %vm85_vm1, %v2564_v38  ;;  %3539 = vmatpush.msk.msra.mxu3 %vm92_vm0, %v2697_v53  ;;  %v3201_v38 = vld [vmem:[%s5431_s16 + $0x10] sm:$0xff] }
 0x3f3   :  { %v2541_v52 = vpop.f32.mrf.mxu1  ;;  %3225 = vmatpush.msra.mxu0 %v3202_v44 }
 0x3f4   :  { %3528 = vmatmul.msk.f32.vlgmr.msra.gmra.mxu1 %vm85_vm1, %v2541_v52  ;;  %v3200_v52 = vld [vmem:[%s5431_s16 + $0x8] sm:$0xff] }
 0x3f5   :  { %3226 = vmatpush.msra.mxu0 %v3201_v38 }
 0x3f7   :  { %3227 = vmatpush.msra.mxu0 %v3200_v52 }
 0x3f8   :  { %v2587_v35 = vpop.f32.mrf.mxu3  ;;  %v2610_v51 = vpop.f32.mrf.mxu0 }
 0x3f9   :  { %v2656_v4 = vpop.f32.mrf.mxu2  ;;  %3532 = vmatmul.msk.f32.vlgmr.msrb.gmra.mxu3 %vm85_vm1, %v2587_v35  ;;  %3534 = vmatmul.msk.f32.vlgmr.msrb.gmra.mxu0 %vm85_vm1, %v2610_v51 }
 0x3fa   :  { %3538 = vmatmul.msk.f32.vlgmr.msrb.gmra.mxu2 %vm85_vm1, %v2656_v4  ;;  %v3199_v4 = vld [vmem:[%s5431_s16] sm:$0xff] }
 0x3fb   :  { %3228 = vmatpush.msra.mxu0 %v3199_v4 }
 0x3fd   :  { %v2633_v49 = vpop.f32.mrf.mxu1 }
 0x3fe   :  { %3536 = vmatmul.msk.f32.vlgmr.msrb.gmra.mxu1 %vm85_vm1, %v2633_v49 }
 0x400   :  { %v2679_v58 = vpop.f32.mrf.mxu3 }
 0x401   :  { %3540 = vmatmul.msk.f32.vlgmr.msra.gmra.mxu3 %vm85_vm1, %v2679_v58  ;;  %v3245_v58 = vld [vmem:[%s5433_s18 + $0x38] sm:$0xff] }
 0x402   :  { %3265 = vmatpush.msra.mxu1 %v3245_v58  ;;  %v3366_v58 = vld [vmem:[%s5438_s23 + $0x18] sm:$0xff] }
 0x403   :  { %3382 = vmatpush.msrb.mxu3 %v3366_v58 }
 0x439   :  { %v2747_v22 = vpop.f32.mrf.mxu1 }
 0x43a   :  { %v2721_v23 = vpop.f32.mrf.mxu0 }
 0x43b   :  { %v3114_v26 = vadd.f32 %v2747_v22, %v2721_v23  ;;  %v3244_v23 = vld [vmem:[%s5433_s18 + $0x30] sm:$0xff] }
 0x43c   :  { %3266 = vmatpush.msra.mxu1 %v3244_v23  ;;  %v3365_v23 = vld [vmem:[%s5438_s23 + $0x10] sm:$0xff] }
 0x43d   :  { %3383 = vmatpush.msrb.mxu3 %v3365_v23 }
 0x45a   :  { %v2773_v1 = vpop.f32.mrf.mxu2 }
 0x45b   :  { %v3116_v31 = vadd.f32 %v3114_v26, %v2773_v1  ;;  %v3243_v1 = vld [vmem:[%s5433_s18 + $0x28] sm:$0xff] }
 0x45c   :  { %3267 = vmatpush.msra.mxu1 %v3243_v1 }
 0x462   :  { %v2799_v2 = vpop.f32.mrf.mxu3 }
 0x463   :  { %v3118_v42 = vadd.f32 %v3116_v31, %v2799_v2 }
 0x465   :  { %v2877_v56 = vpop.f32.mrf.mxu2 }
 0x466   :  { %v2825_v24 = vpop.f32.mrf.mxu0  ;;  %v2851_v11 = vpop.f32.mrf.mxu1 }
 0x467   :  { %v3120_v6 = vadd.f32 %v3118_v42, %v2825_v24  ;;  %v3242_v42 = vld [vmem:[%s5433_s18 + $0x20] sm:$0xff] }
 0x468   :  { %3268 = vmatpush.msra.mxu1 %v3242_v42 }
 0x469   :  { %v3122_v13 = vadd.f32 %v3120_v6, %v2851_v11  ;;  %v3241_v11 = vld [vmem:[%s5433_s18 + $0x18] sm:$0xff] }
 0x46a   :  { %3269 = vmatpush.msra.mxu1 %v3241_v11 }
 0x46b   :  { %v3124_v34 = vadd.f32 %v3122_v13, %v2877_v56  ;;  %v3604_v56 = vld [vmem:[%s5429_s14] ss:$0 sm:$0xff] }
 0x46e   :  { %v2929_v37 = vpop.f32.mrf.mxu0 }
 0x471   :  { %v2955_v17 = vpop.f32.mrf.mxu1 }
 0x472   :  { %v3115_v12 = vadd.f32 %v2955_v17, %v2929_v37  ;;  %v3605_v17 = vld [vmem:[%s5430_s15] ss:$0 sm:$0xff] }
 0x474   :  { %v2903_v18 = vpop.f32.mrf.mxu3 }
 0x475   :  { %v3126_v14 = vadd.f32 %v3124_v34, %v2903_v18  ;;  %v2981_v33 = vpop.f32.mrf.mxu2 }
 0x476   :  { %v3117_v61 = vadd.f32 %v3115_v12, %v2981_v33  ;;  %v3033_v62 = vpop.f32.mrf.mxu0 }
 0x477   :  { %v3132_v20 = vadd.f32 %v3603_v27, %v3126_v14 }
 0x479   :  { %v3134_v0 = vadd.f32 %v3132_v20, %v3968_v50  ;;  %v3710_v50 = vmov 32.0  }
 0x47a   :  { %3674 = vrcp.f32 %v3710_v50  ;;  %v3607_v50 = vld [vmem:[%s5434_s19] ss:$0 sm:$0xff] }
 0x47b   :  { %v3138_v59 = vsel %vm129_vm2, %v3134_v0, 0.0  ;;  %v3059_v15 = vpop.f32.mrf.mxu1 }
 0x47c   :  { %3139 = vadd.xlane.f32.xlu2 %v3138_v59  ;;  %v3007_v54 = vpop.f32.mrf.mxu3 }
 0x47d   :  { %v3119_v19 = vadd.f32 %v3117_v61, %v3007_v54  ;;  %v3085_v29 = vpop.f32.mrf.mxu2 }
 0x47f   :  { %v3121_v16 = vadd.f32 %v3119_v19, %v3033_v62 }
 0x480   :  { %v3675_v46 = vpop.eup %3674 }
 0x481   :  { %v3123_v39 = vadd.f32 %v3121_v16, %v3059_v15  ;;  %v3145_v28 = vmul.f32 32.0, %v3675_v46  ;;  %vm3149_vm0 = vweird.f32 %v3675_v46  ;;  %v3240_v15 = vld [vmem:[%s5433_s18 + $0x10] sm:$0xff]  ;;  %v3239_v16 = vld [vmem:[%s5433_s18 + $0x8] sm:$0xff] }
 0x482   :  { %3270 = vmatpush.msra.mxu1 %v3240_v15 }
 0x483   :  { %v3125_v8 = vadd.f32 %v3123_v39, %v3085_v29  ;;  %v3146_v30 = vsub.f32 1.0, %v3145_v28  ;;  %v3238_v39 = vld [vmem:[%s5433_s18] sm:$0xff] }
 0x484   :  { %v3111_v9 = vpop.f32.mrf.mxu3  ;;  %3271 = vmatpush.msra.mxu1 %v3239_v16  ;;  %v3606_v29 = vld [vmem:[%s5432_s17] ss:$0 sm:$0xff] }
 0x485   :  { %v3127_v43 = vadd.f32 %v3125_v8, %v3111_v9  ;;  %v3147_v32 = vmul.f32 %v3675_v46, %v3146_v30 }
 0x486   :  { %3272 = vmatpush.msra.mxu1 %v3238_v39 }
 0x487   :  { %v3133_v63 = vadd.f32 %v3603_v27, %v3127_v43  ;;  %v3148_v48 = vadd.f32 %v3675_v46, %v3147_v32 }
 0x489   :  { %v3135_v55 = vadd.f32 %v3133_v63, %v4045_v10  ;;  %v5324_v21 = vsel %vm3149_vm0, %v3675_v46, %v3148_v48  ;;  %vm3390_vm0 = vcmask 25600  }
 0x48b   :  { %v3141_v5 = vsel %vm129_vm2, %v3135_v55, 0.0 }
 0x48c   :  { %3142 = vadd.xlane.f32.xlu0 %v3141_v5 }
 0x4ef   :  { %v3140_v45 = vpop.xlane.xlu2 %3139 }
 0x4f0   :  { %v3151_v36 = vmul.f32 %v5324_v21, %v3140_v45 }
 0x4f2   :  { %v3153_v47 = vsub.f32 %v3134_v0, %v3151_v36 }
 0x4f4   :  { %v3155_v57 = vmul.f32 %v3153_v47, %v3153_v47 }
 0x4f6   :  { %v3157_v10 = vsel %vm129_vm2, %v3155_v57, 0.0 }
 0x4f7   :  { %3158 = vadd.xlane.f32.xlu1 %v3157_v10 }
 0x4ff   :  { %v3143_v7 = vpop.xlane.xlu0 %3142 }
 0x500   :  { %v3152_v40 = vmul.f32 %v5324_v21, %v3143_v7 }
 0x502   :  { %v3154_v25 = vsub.f32 %v3135_v55, %v3152_v40 }
 0x504   :  { %v3156_v60 = vmul.f32 %v3154_v25, %v3154_v25 }
 0x506   :  { %v3160_v41 = vsel %vm129_vm2, %v3156_v60, 0.0 }
 0x507   :  { %3161 = vadd.xlane.f32.xlu2 %v3160_v41 }
 0x56a   :  { %v3159_v53 = vpop.xlane.xlu1 %3158 }
 0x56b   :  { %v3163_v3 = vmul.f32 %v3159_v53, %v5324_v21 }
 0x56d   :  { %v3165_v35 = vadd.f32 1e-05, %v3163_v3 }
 0x56f   :  { %3676 = vrsqrt.f32 %v3165_v35  ;;  %vm3173_vm3 = vweird.f32 %v3165_v35 }
 0x575   :  { %v3677_v51 = vpop.eup %3676 }
 0x576   :  { %v3168_v49 = vmul.f32 %v3677_v51, %v3165_v35  ;;  %vm3174_vm1 = vweird.f32 %v3677_v51 }
 0x577   :  { %vm3175_vm10 = vmor %vm3173_vm3, %vm3174_vm1 }
 0x578   :  { %v3169_v22 = vmul.f32 %v3677_v51, %v3168_v49 }
 0x57a   :  { %v3170_v26 = vmul.f32 0.5, %v3169_v22  ;;  %v3162_v2 = vpop.xlane.xlu2 %3161 }
 0x57b   :  { %v3164_v31 = vmul.f32 %v3162_v2, %v5324_v21 }
 0x57c   :  { %v3171_v24 = vsub.f32 1.5, %v3170_v26  ;;  %v3364_v26 = vld [vmem:[%s5438_s23 + $0x8] sm:$0xff] }
 0x57d   :  { %v3166_v6 = vadd.f32 1e-05, %v3164_v31  ;;  %v3363_v31 = vld [vmem:[%s5438_s23] sm:$0xff]  ;;  %3384 = vmatpush.msrb.mxu3 %v3364_v26 }
 0x57e   :  { %v3172_v13 = vmul.f32 %v3677_v51, %v3171_v24 }
 0x57f   :  { %3678 = vrsqrt.f32 %v3166_v6  ;;  %vm3183_vm11 = vweird.f32 %v3166_v6  ;;  %3385 = vmatpush.msrb.mxu3 %v3363_v31 }
 0x580   :  { %v3176_v34 = vsel %vm3175_vm10, %v3677_v51, %v3172_v13 }
 0x581   :  { %v3187_v27 = vmul.f32 %v3176_v34, %v3153_v47 }
 0x583   :  { %v3192_v37 = vmul.f32 %v3604_v56, %v3187_v27 }
 0x585   :  { %v3679_v18 = vpop.eup %3678  ;;  %v3197_v14 = vadd.f32 %v3605_v17, %v3192_v37  ;;  %v3608_v37 = vld [vmem:[%s5435_s20] ss:$0 sm:$0xff]  ;;  %s3711_s20 = smov [#allocation2]  }
 0x586   :  { %v3178_v12 = vmul.f32 %v3679_v18, %v3166_v6  ;;  %vm3184_vm14 = vweird.f32 %v3679_v18  ;;  %s3397_s12 = sshll.u32 %s3711_s20, 4  ;;  %s3398_s12 = int_to_ptr.vmem [resolvable:$true] %s3397_s12 }
 0x587   :  { %3541 = vmatmul.msk.f32.vlgmr.msra.gmra.mxu0 %vm129_vm2, %v3197_v14  ;;  %vm3185_vm8 = vmor %vm3183_vm11, %vm3184_vm14 }
 0x588   :  { %v3179_v20 = vmul.f32 %v3679_v18, %v3178_v12 }
 0x58a   :  { %v3180_v33 = vmul.f32 0.5, %v3179_v20 }
 0x58c   :  { %v3181_v0 = vsub.f32 1.5, %v3180_v33  ;;  %v3609_v33 = vld [vmem:[%s5436_s21] ss:$0 sm:$0xff]  ;;  %s3399_s21 = sshll.u32 %s5439_s24, 4  ;;  %s3400_s21 = int_to_ptr.hbm [resolvable:$true] %s3399_s21 }
 0x58e   :  { %v3182_v61 = vmul.f32 %v3679_v18, %v3181_v0 }
 0x590   :  { %v3186_v59 = vsel %vm3185_vm8, %v3679_v18, %v3182_v61 }
 0x591   :  { %v3188_v54 = vmul.f32 %v3186_v59, %v3154_v25 }
 0x593   :  { %v3193_v19 = vmul.f32 %v3604_v56, %v3188_v54  ;;  %v3338_v54 = vld [vmem:[%s5437_s22] sm:$0x3] }
 0x595   :  { %v3198_v62 = vadd.f32 %v3605_v17, %v3193_v19 }
 0x597   :  { %3542 = vmatmul.msk.f32.gmra.mxu0 %vm129_vm2, %v3198_v62 }
 0x604   :  { %v3230_v8 = vpop.f32.mrf.mxu0 }
 0x605   :  { %v3231_v9 = vadd.f32 %v3606_v29, %v3230_v8 }
 0x607   :  { %v3236_v43 = vmax.f32 %v3231_v9, 0.0 }
 0x609   :  { %3543 = vmatmul.msk.f32.vlgmr.msra.gmra.mxu1 %vm3250_vm9, %v3236_v43 }
 0x614   :  { %v3233_v63 = vpop.f32.mrf.mxu0 }
 0x615   :  { %v3234_v55 = vadd.f32 %v3606_v29, %v3233_v63 }
 0x617   :  { %v3237_v5 = vmax.f32 %v3234_v55, 0.0 }
 0x619   :  { %3544 = vmatmul.msk.f32.gmra.mxu1 %vm3250_vm9, %v3237_v5 }
 0x686   :  { %v3274_v46 = vpop.f32.mrf.mxu1 }
 0x687   :  { %v3275_v28 = vadd.f32 %v3607_v50, %v3274_v46 }
 0x689   :  { %v3280_v30 = vadd.f32 %v3275_v28, %v3197_v14 }
 0x68b   :  { %v3284_v32 = vsel %vm129_vm2, %v3280_v30, 0.0 }
 0x68c   :  { %3285 = vadd.xlane.f32.xlu1 %v3284_v32 }
 0x696   :  { %v3277_v48 = vpop.f32.mrf.mxu1 }
 0x697   :  { %v3278_v45 = vadd.f32 %v3607_v50, %v3277_v48 }
 0x699   :  { %v3281_v36 = vadd.f32 %v3278_v45, %v3198_v62 }
 0x69b   :  { %v3287_v47 = vsel %vm129_vm2, %v3281_v36, 0.0 }
 0x69c   :  { %3288 = vadd.xlane.f32.xlu0 %v3287_v47 }
 0x6ff   :  { %v3286_v57 = vpop.xlane.xlu1 %3285 }
 0x700   :  { %v3290_v10 = vmul.f32 %v3286_v57, %v5324_v21 }
 0x702   :  { %v3292_v7 = vsub.f32 %v3280_v30, %v3290_v10 }
 0x704   :  { %v3294_v40 = vmul.f32 %v3292_v7, %v3292_v7 }
 0x706   :  { %v3296_v25 = vsel %vm129_vm2, %v3294_v40, 0.0 }
 0x707   :  { %3297 = vadd.xlane.f32.xlu0 %v3296_v25 }
 0x70f   :  { %v3289_v60 = vpop.xlane.xlu0 %3288 }
 0x710   :  { %v3291_v41 = vmul.f32 %v3289_v60, %v5324_v21 }
 0x712   :  { %v3293_v44 = vsub.f32 %v3281_v36, %v3291_v41 }
 0x714   :  { %v3295_v38 = vmul.f32 %v3293_v44, %v3293_v44 }
 0x716   :  { %v3299_v53 = vsel %vm129_vm2, %v3295_v38, 0.0 }
 0x717   :  { %3300 = vadd.xlane.f32.xlu2 %v3299_v53 }
 0x77a   :  { %v3298_v3 = vpop.xlane.xlu0 %3297 }
 0x77b   :  { %v3302_v52 = vmul.f32 %v3298_v3, %v5324_v21 }
 0x77d   :  { %v3304_v35 = vadd.f32 1e-05, %v3302_v52 }
 0x77f   :  { %3680 = vrsqrt.f32 %v3304_v35  ;;  %vm3312_vm5 = vweird.f32 %v3304_v35 }
 0x785   :  { %v3681_v4 = vpop.eup %3680 }
 0x786   :  { %v3307_v51 = vmul.f32 %v3681_v4, %v3304_v35  ;;  %vm3313_vm4 = vweird.f32 %v3681_v4 }
 0x787   :  { %vm3314_vm12 = vmor %vm3312_vm5, %vm3313_vm4 }
 0x788   :  { %v3308_v1 = vmul.f32 %v3681_v4, %v3307_v51 }
 0x78a   :  { %v3301_v49 = vpop.xlane.xlu2 %3300  ;;  %v3309_v42 = vmul.f32 0.5, %v3308_v1 }
 0x78b   :  { %v3303_v22 = vmul.f32 %v3301_v49, %v5324_v21 }
 0x78c   :  { %v3310_v24 = vsub.f32 1.5, %v3309_v42 }
 0x78d   :  { %v3305_v2 = vadd.f32 1e-05, %v3303_v22 }
 0x78e   :  { %v3311_v21 = vmul.f32 %v3681_v4, %v3310_v24 }
 0x78f   :  { %3682 = vrsqrt.f32 %v3305_v2  ;;  %vm3322_vm7 = vweird.f32 %v3305_v2 }
 0x790   :  { %v3315_v34 = vsel %vm3314_vm12, %v3681_v4, %v3311_v21 }
 0x791   :  { %v3326_v18 = vmul.f32 %v3315_v34, %v3292_v7 }
 0x793   :  { %v3331_v0 = vmul.f32 %v3608_v37, %v3326_v18 }
 0x795   :  { %v3683_v6 = vpop.eup %3682  ;;  %v3336_v59 = vadd.f32 %v3609_v33, %v3331_v0 }
 0x796   :  { %v3317_v11 = vmul.f32 %v3683_v6, %v3305_v2  ;;  %vm3323_vm13 = vweird.f32 %v3683_v6 }
 0x797   :  { %vm3324_vm15 = vmor %vm3322_vm7, %vm3323_vm13 }
 0x798   :  { %v3318_v13 = vmul.f32 %v3683_v6, %v3317_v11 }
 0x79a   :  { %v3319_v56 = vmul.f32 0.5, %v3318_v13 }
 0x79c   :  { %v3320_v17 = vsub.f32 1.5, %v3319_v56 }
 0x79e   :  { %v3321_v27 = vmul.f32 %v3683_v6, %v3320_v17 }
 0x7a0   :  { %v3325_v14 = vsel %vm3324_vm15, %v3683_v6, %v3321_v27 }
 0x7a1   :  { %v3327_v12 = vmul.f32 %v3325_v14, %v3293_v44 }
 0x7a3   :  { %v3332_v20 = vmul.f32 %v3608_v37, %v3327_v12 }
 0x7a5   :  { %v3337_v61 = vadd.f32 %v3609_v33, %v3332_v20 }
 0x7a7   :  { %3357 = vmatpush.msra.mxu2 %v3337_v61 }
 0x7a9   :  { %3358 = vmatpush.msra.mxu2 %v3336_v59 }
 0x7aa   :  { %3545 = vmatmul.msk.f32.vlgmr.msra.gmra.mxu2 %vm3339_vm6, %v3338_v54 }
 0x82d   :  { %v3360_v19 = vpop.f32.mrf.mxu2 }
 0x82e   :  { %3546 = vmatmul.msk.f32.vlgmr.msrb.gmra.mxu3 %vm129_vm2, %v3360_v19 }
 0x8b1   :  { %v3387_v62 = vpop.f32.mrf.mxu3 }
 0x8b2   :  { %3391 = vst.msk [vmem:[#allocation2] sm:$0x3] %vm3390_vm0, %v3387_v62 }
 0x8b3   :  { %3402 = dma.vmem_to_hbm [thread:$0]  %s3398_s12, 32, %s3400_s21, [#allocation3]  }
 0x8b4   :  { %3708 = dma.done.wait [#allocation3], 32  }
 0x8b5   :  { %3709 = vsyncadd [#allocation3], 4294967264 }
 0x8b6   :  { %3407 = vsyncpa [#allocation3], 1 }

</bundles_post_ra>
